<compile_context>
chip_gen: v7x
topology: tpu7x:2x2x1
jax: 0.10.0
libtpu: 0.0.40
codegen_flags: <defaults>
</compile_context>

<pallas_src>
import jax
import jax.numpy as jnp
from jax.experimental import pallas as pl
from jax.experimental.pallas import tpu as pltpu

EPS = 1e-5  # nn.InstanceNorm2d default


def _conv3x3_instnorm(xb, w_ref, H, W, C):
    """Reflect-pad-1 3x3 conv + InstanceNorm2d(affine=False), fully in VMEM.

    xb:    (H, W, C) bf16 activation (unpadded).
    w_ref: (9*C, C) bf16 weight ref, contraction axis ordered (kh, kw, cin).
    Returns the normalized conv output as an (H*W, C) f32 array.
    """
    # Reflect-pad along H: leading-axis concat, no sublane relayout.
    xh = jnp.concatenate([xb[1:2], xb, xb[H - 2:H - 1]], axis=0)        # (H+2, W, C)
    # The three kw taps as W-shifted views with reflected edges; only the
    # left / right views shift the sublane axis (2 relayouts total).
    left = jnp.concatenate([xh[:, 1:2], xh[:, :W - 1]], axis=1)         # kw = 0
    right = jnp.concatenate([xh[:, 1:W], xh[:, W - 2:W - 1]], axis=1)   # kw = 2
    xs = jnp.concatenate([left, xh, right], axis=-1)                    # (H+2, W, 3C)
    # All 9 taps stacked on the contraction axis -> one K=9C MXU matmul.
    im = jnp.concatenate([xs[0:H], xs[1:H + 1], xs[2:H + 2]], axis=-1)  # (H, W, 9C)
    acc = jnp.dot(im.reshape(H * W, 9 * C), w_ref[...],
                  preferred_element_type=jnp.float32)                   # (H*W, C) f32

    # InstanceNorm with a centered second pass (precision) over H*W per channel.
    # Conv bias intentionally omitted: cancelled exactly by the mean subtraction.
    inv_hw = 1.0 / float(H * W)
    mean = jnp.sum(acc, axis=0, keepdims=True) * inv_hw
    centered = acc - mean
    var = jnp.sum(centered * centered, axis=0, keepdims=True) * inv_hw
    return centered * jax.lax.rsqrt(var + EPS)


def _resblock_kernel(x_ref, w1_ref, w2_ref, o_ref):
    """Fused residual block for one batch element (whole image resident in VMEM)."""
    _, H, W, C = o_ref.shape
    x = x_ref[0]                                                        # (H, W, C) f32
    y = _conv3x3_instnorm(x.astype(jnp.bfloat16), w1_ref, H, W, C)      # conv1 + IN
    # ReLU; keep the stage-1 activation in bf16 (single cast, no extra f32 copy).
    yb = jnp.maximum(y, 0.0).astype(jnp.bfloat16).reshape(H, W, C)
    z = _conv3x3_instnorm(yb, w2_ref, H, W, C).reshape(H, W, C)         # conv2 + IN
    o_ref[0] = x + z                                                    # residual add


def _vmem_limit_bytes():
    """Generation-aware scoped-VMEM limit: physical capacity minus headroom."""
    cap = 64 * 2**20
    try:
        cap = int(getattr(pltpu.get_tpu_info(), "vmem_capacity_bytes", cap))
    except Exception:
        pass
    return max(16 * 2**20, cap - 8 * 2**20)


def _residual_block_nhwc(x_nhwc, w1s, w2s):
    N, H, W, C = x_nhwc.shape
    assert H >= 2 and W >= 2, "ReflectionPad2d(1) requires H >= 2 and W >= 2"
    # TODO(synk): for images whose working set (~50*H*W*C bytes) exceeds the VMEM
    # limit (mainly v7x, 64 MiB), tile H into row bands with an
    # accumulate-then-normalize InstanceNorm and a second (parallel) band grid
    # axis so both v7x TensorCores stay busy even when N == 1.
    return pl.pallas_call(
        _resblock_kernel,
        out_shape=jax.ShapeDtypeStruct((N, H, W, C), jnp.float32),
        grid_spec=pltpu.PrefetchScalarGridSpec(
            num_scalar_prefetch=0,
            grid=(N,),
            in_specs=[
                pl.BlockSpec((1, H, W, C), lambda n: (n, 0, 0, 0)),
                pl.BlockSpec((9 * C, C), lambda n: (0, 0)),
                pl.BlockSpec((9 * C, C), lambda n: (0, 0)),
            ],
            out_specs=pl.BlockSpec((1, H, W, C), lambda n: (n, 0, 0, 0)),
        ),
        compiler_params=pltpu.CompilerParams(
            dimension_semantics=("parallel",),
            vmem_limit_bytes=_vmem_limit_bytes()),
    )(x_nhwc, w1s, w2s)


def convert_torch_conv_weight(w_oihw):
    """PyTorch Conv2d weight (Cout, Cin, 3, 3) -> im2col (9*Cin, Cout) bf16."""
    cout, cin, kh, kw = w_oihw.shape
    w = jnp.transpose(w_oihw, (2, 3, 1, 0))            # (kh, kw, Cin, Cout)
    return w.reshape(kh * kw * cin, cout).astype(jnp.bfloat16)


@jax.jit
def residual_block(x_nchw, w1_oihw, w2_oihw):
    """x_nchw: (N, C, H, W) f32; w*_oihw: PyTorch (Cout, Cin, 3, 3) conv weights.

    Conv biases are not taken: InstanceNorm2d(affine=False) cancels them exactly.
    Matches the f32 PyTorch reference to bf16-matmul tolerance.
    NOTE: callers already in NHWC should use _residual_block_nhwc directly to
    avoid the boundary transposes; emit bf16 outputs if the downstream consumer
    tolerates it (halves HBM writeback).
    """
    N, C, H, W = x_nchw.shape
    # Lane alignment: pad channels to a multiple of 128 when the overhead is
    # modest (C >= 64).  Padded channels stay exactly zero through the block.
    Cp = ((C + 127) // 128) * 128 if (C % 128 != 0 and C >= 64) else C
    pad_c = Cp - C
    if pad_c:
        x_nchw = jnp.pad(x_nchw, ((0, 0), (0, pad_c), (0, 0), (0, 0)))
        w1_oihw = jnp.pad(w1_oihw, ((0, pad_c), (0, pad_c), (0, 0), (0, 0)))
        w2_oihw = jnp.pad(w2_oihw, ((0, pad_c), (0, pad_c), (0, 0), (0, 0)))

    x = jnp.transpose(x_nchw, (0, 2, 3, 1)).astype(jnp.float32)         # NHWC
    w1s = convert_torch_conv_weight(w1_oihw)
    w2s = convert_torch_conv_weight(w2_oihw)
    out = _residual_block_nhwc(x, w1s, w2s)
    out = jnp.transpose(out, (0, 3, 1, 2))                              # back to NCHW
    if pad_c:
        out = out[:, :C]
    return out


def _reference(x_nchw, w1_oihw, w2_oihw):
    """Pure-JAX f32 reference of the PyTorch block (for tolerance testing)."""
    def conv_in(x, w):
        xp = jnp.pad(x, ((0, 0), (0, 0), (1, 1), (1, 1)), mode="reflect")
        y = jax.lax.conv_general_dilated(
            xp, w, window_strides=(1, 1), padding="VALID",
            dimension_numbers=("NCHW", "OIHW", "NCHW"))
        mean = jnp.mean(y, axis=(2, 3), keepdims=True)
        var = jnp.mean((y - mean) ** 2, axis=(2, 3), keepdims=True)
        return (y - mean) * jax.lax.rsqrt(var + EPS)

    y = jax.nn.relu(conv_in(x_nchw, w1_oihw))
    return x_nchw + conv_in(y, w2_oihw)


if __name__ == "__main__":
    N, C, H, W = 2, 4, 16, 16

    key = jax.random.PRNGKey(0)
    kx, kw1, kw2 = jax.random.split(key, 3)

    x = jax.random.normal(kx, (N, C, H, W), dtype=jnp.float32)

    # Conv2d(C, C, 3) weights in genuine PyTorch layout (Cout, Cin, kh, kw).
    scale = 1.0 / jnp.sqrt(C * 9.0)
    w1 = jax.random.normal(kw1, (C, C, 3, 3), dtype=jnp.float32) * scale
    w2 = jax.random.normal(kw2, (C, C, 3, 3), dtype=jnp.float32) * scale

    out = residual_block(x, w1, w2)
    jax.block_until_ready(out)
    assert out.shape == (N, C, H, W), out.shape

    # bf16-matmul tolerance check against the f32 reference.
    ref = _reference(x, w1, w2)
    max_err = float(jnp.max(jnp.abs(out - ref)))
    assert max_err < 1e-1, f"max abs error vs f32 reference: {max_err}"
    print("KERNEL_OK")
</pallas_src>

<mosaic_0001>
module attributes {stable_mosaic.version = 11 : i64} {
  func.func @_resblock_kernel(%arg0: i32, %arg1: memref<1x16x16x4xf32, #tpu.memory_space<vmem>>, %arg2: memref<36x4xbf16, #tpu.memory_space<vmem>>, %arg3: memref<36x4xbf16, #tpu.memory_space<vmem>>, %arg4: memref<1x16x16x4xf32, #tpu.memory_space<vmem>>) attributes {dimension_semantics = [#tpu.dimension_semantics<parallel>], iteration_bounds = array<i64: 2>, scalar_prefetch = 0 : i64, scratch_operands = 0 : i64, tpu.core_type = #tpu.core_type<tc>, window_params = [{transform_indices = @transform_0, window_bounds = array<i64: 1, 16, 16, 4>}, {pipeline_mode = #tpu.pipeline_mode<synchronous>, transform_indices = @transform_1, window_bounds = array<i64: 36, 4>}, {pipeline_mode = #tpu.pipeline_mode<synchronous>, transform_indices = @transform_2, window_bounds = array<i64: 36, 4>}, {transform_indices = @transform_3, window_bounds = array<i64: 1, 16, 16, 4>}]} {
    %c0 = arith.constant 0 : index
    %c0_0 = arith.constant 0 : index
    %c0_1 = arith.constant 0 : index
    %c0_2 = arith.constant 0 : index
    %0 = vector.load %arg1[%c0, %c0_0, %c0_1, %c0_2] : memref<1x16x16x4xf32, #tpu.memory_space<vmem>>, vector<1x16x16x4xf32>
    %1 = vector.shape_cast %0 : vector<1x16x16x4xf32> to vector<16x16x4xf32>
    %2 = arith.truncf %1 : vector<16x16x4xf32> to vector<16x16x4xbf16>
    %3 = vector.extract_strided_slice %2 {offsets = [1, 0, 0], sizes = [1, 16, 4], strides = [1, 1, 1]} : vector<16x16x4xbf16> to vector<1x16x4xbf16>
    %4 = vector.extract_strided_slice %2 {offsets = [14, 0, 0], sizes = [1, 16, 4], strides = [1, 1, 1]} : vector<16x16x4xbf16> to vector<1x16x4xbf16>
    %5 = tpu.concatenate %3, %2, %4 in 0 : vector<1x16x4xbf16>, vector<16x16x4xbf16>, vector<1x16x4xbf16> -> vector<18x16x4xbf16>
    %6 = vector.extract_strided_slice %5 {offsets = [0, 1, 0], sizes = [18, 1, 4], strides = [1, 1, 1]} : vector<18x16x4xbf16> to vector<18x1x4xbf16>
    %7 = vector.extract_strided_slice %5 {offsets = [0, 0, 0], sizes = [18, 15, 4], strides = [1, 1, 1]} : vector<18x16x4xbf16> to vector<18x15x4xbf16>
    %8 = tpu.concatenate %6, %7 in 1 : vector<18x1x4xbf16>, vector<18x15x4xbf16> -> vector<18x16x4xbf16>
    %9 = vector.extract_strided_slice %5 {offsets = [0, 1, 0], sizes = [18, 15, 4], strides = [1, 1, 1]} : vector<18x16x4xbf16> to vector<18x15x4xbf16>
    %10 = vector.extract_strided_slice %5 {offsets = [0, 14, 0], sizes = [18, 1, 4], strides = [1, 1, 1]} : vector<18x16x4xbf16> to vector<18x1x4xbf16>
    %11 = tpu.concatenate %9, %10 in 1 : vector<18x15x4xbf16>, vector<18x1x4xbf16> -> vector<18x16x4xbf16>
    %12 = tpu.concatenate %8, %5, %11 in 2 : vector<18x16x4xbf16>, vector<18x16x4xbf16>, vector<18x16x4xbf16> -> vector<18x16x12xbf16>
    %13 = vector.extract_strided_slice %12 {offsets = [0, 0, 0], sizes = [16, 16, 12], strides = [1, 1, 1]} : vector<18x16x12xbf16> to vector<16x16x12xbf16>
    %14 = vector.extract_strided_slice %12 {offsets = [1, 0, 0], sizes = [16, 16, 12], strides = [1, 1, 1]} : vector<18x16x12xbf16> to vector<16x16x12xbf16>
    %15 = vector.extract_strided_slice %12 {offsets = [2, 0, 0], sizes = [16, 16, 12], strides = [1, 1, 1]} : vector<18x16x12xbf16> to vector<16x16x12xbf16>
    %16 = tpu.concatenate %13, %14, %15 in 2 : vector<16x16x12xbf16>, vector<16x16x12xbf16>, vector<16x16x12xbf16> -> vector<16x16x36xbf16>
    %17 = vector.shape_cast %16 : vector<16x16x36xbf16> to vector<256x36xbf16>
    %c0_3 = arith.constant 0 : index
    %c0_4 = arith.constant 0 : index
    %18 = vector.load %arg2[%c0_3, %c0_4] : memref<36x4xbf16, #tpu.memory_space<vmem>>, vector<36x4xbf16>
    %cst = arith.constant dense<0.000000e+00> : vector<256x4xf32>
    %19 = tpu.matmul %17, %18, %cst {dimension_numbers = #tpu.dot_dimension_numbers<[1], [0], [0], [1], [0, 0, 1, 1], [], []>} : vector<256x36xbf16>, vector<36x4xbf16>, vector<256x4xf32> -> vector<256x4xf32>
    %cst_5 = arith.constant dense<0.000000e+00> : vector<4xf32>
    %20 = vector.multi_reduction <add>, %19, %cst_5 [0] : vector<256x4xf32> to vector<4xf32>
    %21 = vector.shape_cast %20 : vector<4xf32> to vector<1x4xf32>
    %cst_6 = arith.constant 3.906250e-03 : f32
    %22 = vector.broadcast %cst_6 : f32 to vector<1x4xf32>
    %23 = arith.mulf %21, %22 : vector<1x4xf32>
    %24 = vector.broadcast %23 : vector<1x4xf32> to vector<256x4xf32>
    %25 = arith.subf %19, %24 : vector<256x4xf32>
    %26 = arith.mulf %25, %25 : vector<256x4xf32>
    %cst_7 = arith.constant dense<0.000000e+00> : vector<4xf32>
    %27 = vector.multi_reduction <add>, %26, %cst_7 [0] : vector<256x4xf32> to vector<4xf32>
    %28 = vector.shape_cast %27 : vector<4xf32> to vector<1x4xf32>
    %cst_8 = arith.constant 3.906250e-03 : f32
    %29 = vector.broadcast %cst_8 : f32 to vector<1x4xf32>
    %30 = arith.mulf %28, %29 : vector<1x4xf32>
    %cst_9 = arith.constant 9.99999974E-6 : f32
    %31 = vector.broadcast %cst_9 : f32 to vector<1x4xf32>
    %32 = arith.addf %30, %31 : vector<1x4xf32>
    %33 = math.rsqrt %32 : vector<1x4xf32>
    %34 = vector.broadcast %33 : vector<1x4xf32> to vector<256x4xf32>
    %35 = arith.mulf %25, %34 : vector<256x4xf32>
    %cst_10 = arith.constant 0.000000e+00 : f32
    %36 = vector.broadcast %cst_10 : f32 to vector<256x4xf32>
    %37 = arith.maximumf %35, %36 : vector<256x4xf32>
    %38 = arith.truncf %37 : vector<256x4xf32> to vector<256x4xbf16>
    %39 = vector.shape_cast %38 : vector<256x4xbf16> to vector<16x16x4xbf16>
    %40 = vector.extract_strided_slice %39 {offsets = [1, 0, 0], sizes = [1, 16, 4], strides = [1, 1, 1]} : vector<16x16x4xbf16> to vector<1x16x4xbf16>
    %41 = vector.extract_strided_slice %39 {offsets = [14, 0, 0], sizes = [1, 16, 4], strides = [1, 1, 1]} : vector<16x16x4xbf16> to vector<1x16x4xbf16>
    %42 = tpu.concatenate %40, %39, %41 in 0 : vector<1x16x4xbf16>, vector<16x16x4xbf16>, vector<1x16x4xbf16> -> vector<18x16x4xbf16>
    %43 = vector.extract_strided_slice %42 {offsets = [0, 1, 0], sizes = [18, 1, 4], strides = [1, 1, 1]} : vector<18x16x4xbf16> to vector<18x1x4xbf16>
    %44 = vector.extract_strided_slice %42 {offsets = [0, 0, 0], sizes = [18, 15, 4], strides = [1, 1, 1]} : vector<18x16x4xbf16> to vector<18x15x4xbf16>
    %45 = tpu.concatenate %43, %44 in 1 : vector<18x1x4xbf16>, vector<18x15x4xbf16> -> vector<18x16x4xbf16>
    %46 = vector.extract_strided_slice %42 {offsets = [0, 1, 0], sizes = [18, 15, 4], strides = [1, 1, 1]} : vector<18x16x4xbf16> to vector<18x15x4xbf16>
    %47 = vector.extract_strided_slice %42 {offsets = [0, 14, 0], sizes = [18, 1, 4], strides = [1, 1, 1]} : vector<18x16x4xbf16> to vector<18x1x4xbf16>
    %48 = tpu.concatenate %46, %47 in 1 : vector<18x15x4xbf16>, vector<18x1x4xbf16> -> vector<18x16x4xbf16>
    %49 = tpu.concatenate %45, %42, %48 in 2 : vector<18x16x4xbf16>, vector<18x16x4xbf16>, vector<18x16x4xbf16> -> vector<18x16x12xbf16>
    %50 = vector.extract_strided_slice %49 {offsets = [0, 0, 0], sizes = [16, 16, 12], strides = [1, 1, 1]} : vector<18x16x12xbf16> to vector<16x16x12xbf16>
    %51 = vector.extract_strided_slice %49 {offsets = [1, 0, 0], sizes = [16, 16, 12], strides = [1, 1, 1]} : vector<18x16x12xbf16> to vector<16x16x12xbf16>
    %52 = vector.extract_strided_slice %49 {offsets = [2, 0, 0], sizes = [16, 16, 12], strides = [1, 1, 1]} : vector<18x16x12xbf16> to vector<16x16x12xbf16>
    %53 = tpu.concatenate %50, %51, %52 in 2 : vector<16x16x12xbf16>, vector<16x16x12xbf16>, vector<16x16x12xbf16> -> vector<16x16x36xbf16>
    %54 = vector.shape_cast %53 : vector<16x16x36xbf16> to vector<256x36xbf16>
    %c0_11 = arith.constant 0 : index
    %c0_12 = arith.constant 0 : index
    %55 = vector.load %arg3[%c0_11, %c0_12] : memref<36x4xbf16, #tpu.memory_space<vmem>>, vector<36x4xbf16>
    %cst_13 = arith.constant dense<0.000000e+00> : vector<256x4xf32>
    %56 = tpu.matmul %54, %55, %cst_13 {dimension_numbers = #tpu.dot_dimension_numbers<[1], [0], [0], [1], [0, 0, 1, 1], [], []>} : vector<256x36xbf16>, vector<36x4xbf16>, vector<256x4xf32> -> vector<256x4xf32>
    %cst_14 = arith.constant dense<0.000000e+00> : vector<4xf32>
    %57 = vector.multi_reduction <add>, %56, %cst_14 [0] : vector<256x4xf32> to vector<4xf32>
    %58 = vector.shape_cast %57 : vector<4xf32> to vector<1x4xf32>
    %cst_15 = arith.constant 3.906250e-03 : f32
    %59 = vector.broadcast %cst_15 : f32 to vector<1x4xf32>
    %60 = arith.mulf %58, %59 : vector<1x4xf32>
    %61 = vector.broadcast %60 : vector<1x4xf32> to vector<256x4xf32>
    %62 = arith.subf %56, %61 : vector<256x4xf32>
    %63 = arith.mulf %62, %62 : vector<256x4xf32>
    %cst_16 = arith.constant dense<0.000000e+00> : vector<4xf32>
    %64 = vector.multi_reduction <add>, %63, %cst_16 [0] : vector<256x4xf32> to vector<4xf32>
    %65 = vector.shape_cast %64 : vector<4xf32> to vector<1x4xf32>
    %cst_17 = arith.constant 3.906250e-03 : f32
    %66 = vector.broadcast %cst_17 : f32 to vector<1x4xf32>
    %67 = arith.mulf %65, %66 : vector<1x4xf32>
    %cst_18 = arith.constant 9.99999974E-6 : f32
    %68 = vector.broadcast %cst_18 : f32 to vector<1x4xf32>
    %69 = arith.addf %67, %68 : vector<1x4xf32>
    %70 = math.rsqrt %69 : vector<1x4xf32>
    %71 = vector.broadcast %70 : vector<1x4xf32> to vector<256x4xf32>
    %72 = arith.mulf %62, %71 : vector<256x4xf32>
    %73 = vector.shape_cast %72 : vector<256x4xf32> to vector<16x16x4xf32>
    %74 = arith.addf %1, %73 : vector<16x16x4xf32>
    %c0_19 = arith.constant 0 : index
    %c0_20 = arith.constant 0 : index
    %c0_21 = arith.constant 0 : index
    %c0_22 = arith.constant 0 : index
    %75 = vector.load %arg4[%c0_19, %c0_20, %c0_21, %c0_22] : memref<1x16x16x4xf32, #tpu.memory_space<vmem>>, vector<1x16x16x4xf32>
    %76 = vector.shape_cast %75 : vector<1x16x16x4xf32> to vector<16x16x4xf32>
    %77 = vector.shape_cast %74 : vector<16x16x4xf32> to vector<1x16x16x4xf32>
    tpu.vector_store %arg4[%c0_19, %c0_20, %c0_21, %c0_22], %77 {strides = array<i32>} : memref<1x16x16x4xf32, #tpu.memory_space<vmem>>, vector<1x16x16x4xf32>,
    return
  }
  func.func @transform_0(%arg0: i32) -> (i32, i32, i32, i32) {
    %c0_i32 = arith.constant 0 : i32
    %c0_i32_0 = arith.constant 0 : i32
    %c0_i32_1 = arith.constant 0 : i32
    %c0_i32_2 = arith.constant 0 : i32
    return %arg0, %c0_i32, %c0_i32_0, %c0_i32_1 : i32, i32, i32, i32
  }
  func.func @transform_1(%arg0: i32) -> (i32, i32) {
    %c0_i32 = arith.constant 0 : i32
    %c0_i32_0 = arith.constant 0 : i32
    %c0_i32_1 = arith.constant 0 : i32
    return %c0_i32, %c0_i32_0 : i32, i32
  }
  func.func @transform_2(%arg0: i32) -> (i32, i32) {
    %c0_i32 = arith.constant 0 : i32
    %c0_i32_0 = arith.constant 0 : i32
    %c0_i32_1 = arith.constant 0 : i32
    return %c0_i32, %c0_i32_0 : i32, i32
  }
  func.func @transform_3(%arg0: i32) -> (i32, i32, i32, i32) {
    %c0_i32 = arith.constant 0 : i32
    %c0_i32_0 = arith.constant 0 : i32
    %c0_i32_1 = arith.constant 0 : i32
    %c0_i32_2 = arith.constant 0 : i32
    return %arg0, %c0_i32, %c0_i32_0, %c0_i32_1 : i32, i32, i32, i32
  }
}

</mosaic_0001>

<bundles_post_ra>
// kernel: residual_block.1
= control target key start
LH: loop header
LB: loop body
LE: loop exit
PB: predicated region body
PF: predicated region fallthrough
CT: control target
= control target key end

     0   :  { %s2674_s12 = smov 0   ;;  %s4818_s0 = inlined_call_operand.vmem [shape: f32[2,16,16,4], index: 0, kind: input, shape index: {}]   ;;  %s4819_s1 = inlined_call_operand.vmem [shape: bf16[36,4], index: 1, kind: input, shape index: {}]   ;;  %s4820_s2 = inlined_call_operand.vmem [shape: bf16[36,4], index: 2, kind: input, shape index: {}]   ;;  %s4821_s3 = inlined_call_operand.vmem [shape: f32[2,16,16,4], index: 3, kind: output, shape index: {}]  }
   0x1 LB: > { %s2421_s13 = sadd.s32 4294967295, %s2648_s12   ;;  %p2425_p0 = scmp.ge.s32.totalorder %s2648_s12, 1  ;;  %s2648_s12 = sphi %s2674_s12, %s13_s12  }
   0x2   : > { %p137_p1 = scmp.lt.s32.totalorder %s2648_s12, 3 }
   0x4   : > { %p138_p2 = pnand %p2425_p0, %p137_p1 }
   0x5   : > { %p161_p3 = scmp.lt.s32.totalorder (!%p138_p2), %s2421_s13, 1  ;;  %vm448_vm0 = vsmask.f32 (!%p138_p2), 7424  ;;  %s2650_s18 = smov (!%p138_p2), 4   ;;  %vm447_vm1 = vcmask (!%p138_p2), 1047552   ;;  %vm364_vm3 = vcmask (!%p138_p2), 1040384  }
   0x6   : > { %141 = sbr.rel (%p138_p2) target bundleno = 1334 (0x536), region = 32  ;;  %vm2725_vm2 = vmand (!%p138_p2), %vm447_vm1, %vm448_vm0  ;;  %s2651_s19 = smov (!%p138_p2), 8   ;;  %vm365_vm4 = vsmask.f32 (!%p138_p2), 256  ;;  %vm840_vm6 = vcmask (!%p138_p2), 1041408   ;;  %vm562_vm7 = vcmask (!%p138_p2), 31744  }
   0x7   : > { %vm2861_vm5 = vmand (!%p138_p2), %vm364_vm3, %vm365_vm4  ;;  %vm611_vm8 = vcmask (!%p138_p2), 64512   ;;  %s2652_s26 = smov (!%p138_p2), 12   ;;  %s2653_s27 = smov (!%p138_p2), 24   ;;  %vm722_vm9 = vcmask (!%p138_p2), 97280   ;;  %vm755_vm10 = vcmask (!%p138_p2), 195584   ;;  %vm807_vm11 = vcmask (!%p138_p2), 293888  }
   0xd   : > { %s4837_s13 = smov (!%p161_p3, %s2421_s13), 1 }
   0xe   : > { %s2470_s14 = sshll.u32 %s4837_s13, 8 }
   0xf   : > { %s2690_s17 = scalar_lea.vmem %s4818_s0, %s2470_s14  ;;  %s4693_s9 = scalar_lea.vmem %s4821_s3, %s2470_s14 }
  0x10   : > { %v172_v0 = vld [vmem:[%s2690_s17] sm:$0xff]  ;;  %v173_v1 = vld [vmem:[%s2690_s17 + $0x8] sm:$0xff]  ;;  %v174_v5 = vld [vmem:[%s2690_s17 + $0x10] sm:$0xff] }
  0x11   : > { %v176_v2 = vld [vmem:[%s2690_s17 + $0x20] sm:$0xff]  ;;  %v204_v3 = vpack.c.bf16 %v173_v1, %v172_v0  ;;  %v177_v4 = vld [vmem:[%s2690_s17 + $0x28] sm:$0xff]  ;;  %v175_v6 = vld [vmem:[%s2690_s17 + $0x18] sm:$0xff] }
  0x12   : > { %v206_v7 = vpack.c.bf16 %v177_v4, %v176_v2  ;;  %v205_v8 = vpack.c.bf16 %v175_v6, %v174_v5  ;;  %v178_v9 = vld [vmem:[%s2690_s17 + $0x30] sm:$0xff]  ;;  %v179_v10 = vld [vmem:[%s2690_s17 + $0x38] sm:$0xff]  ;;  %v180_v11 = vld [vmem:[%s2690_s17 + $0x40] sm:$0xff] }
  0x13   : > { %484 = vrot.lane.b32.xlu0 %v204_v3, %s2650_s18  ;;  %v2702_v12 = vshrl.u32 %v204_v3, 16  ;;  %v2704_v13 = vshll.u32 %v204_v3, 16  ;;  %v207_v14 = vpack.c.bf16 %v179_v10, %v178_v9  ;;  %v181_v15 = vld [vmem:[%s2690_s17 + $0x48] sm:$0xff]  ;;  %v182_v16 = vld [vmem:[%s2690_s17 + $0x50] sm:$0xff]  ;;  %v183_v17 = vld [vmem:[%s2690_s17 + $0x58] sm:$0xff] }
  0x14   : > { %486 = vrot.lane.b32.xlu1 %v206_v7, %s2650_s18  ;;  %v2710_v18 = vshrl.u32 %v206_v7, 16  ;;  %v2712_v19 = vshrl.u32 %v205_v8, 16  ;;  %v2714_v20 = vshll.u32 %v205_v8, 16  ;;  %v2716_v21 = vshll.u32 %v206_v7, 16  ;;  %v184_v22 = vld [vmem:[%s2690_s17 + $0x60] sm:$0xff]  ;;  %v185_v23 = vld [vmem:[%s2690_s17 + $0x68] sm:$0xff] }
  0x15   : > { %v385_v24 = vrot.slane %v2704_v13, 1  ;;  %v208_v25 = vpack.c.bf16 %v181_v15, %v180_v11  ;;  %v2721_v26 = vshll.u32 %v207_v14, 16  ;;  %v209_v32 = vpack.c.bf16 %v183_v17, %v182_v16  ;;  %v186_v34 = vld [vmem:[%s2690_s17 + $0x70] sm:$0xff]  ;;  %v187_v35 = vld [vmem:[%s2690_s17 + $0x78] sm:$0xff]  ;;  %v188_v40 = vld [vmem:[%s2690_s17 + $0x80] sm:$0xff] }
  0x16   : > { %v383_v28 = vrot.slane %v2714_v20, 1  ;;  %v387_v29 = vrot.slane %v2716_v21, 1  ;;  %v2735_v33 = vpack.c.bf16 %v185_v23, %v184_v22  ;;  %v2741_v38 = vshrl.u32 %v207_v14, 16  ;;  %v189_v41 = vld [vmem:[%s2690_s17 + $0x88] sm:$0xff]  ;;  %v190_v53 = vld [vmem:[%s2690_s17 + $0x90] sm:$0xff]  ;;  %v191_v54 = vld [vmem:[%s2690_s17 + $0x98] sm:$0xff] }
  0x17   : > { %482 = vrot.lane.b32.xlu0 %v205_v8, %s2650_s18  ;;  %v386_v30 = vor.u32 %v385_v24, %v2702_v12  ;;  %v2733_v31 = vshll.u32 %v208_v25, 16  ;;  %v389_v39 = vrot.slane %v2721_v26, 1  ;;  %v2753_v44 = vshrl.u32 %v208_v25, 16  ;;  %v192_v57 = vld [vmem:[%s2690_s17 + $0xa0] sm:$0xff]  ;;  %v193_v58 = vld [vmem:[%s2690_s17 + $0xa8] sm:$0xff]  ;;  %v194_v9 = vld [vmem:[%s2690_s17 + $0xb0] sm:$0xff] }
  0x18   : > { %v384_v36 = vor.u32 %v383_v28, %v2712_v19  ;;  %v388_v37 = vor.u32 %v387_v29, %v2710_v18  ;;  %v2756_v46 = vpack.c.bf16 %v187_v35, %v186_v34  ;;  %v2762_v48 = vshll.u32 %v209_v32, 16  ;;  %v195_v10 = vld [vmem:[%s2690_s17 + $0xb8] sm:$0xff]  ;;  %v196_v22 = vld [vmem:[%s2690_s17 + $0xc0] sm:$0xff]  ;;  %v197_v23 = vld [vmem:[%s2690_s17 + $0xc8] sm:$0xff] }
  0x19   : > { %v451_v42 = vsel %vm2725_vm2, %v386_v30, %v2704_v13  ;;  %v391_v45 = vrot.slane %v2733_v31, 1  ;;  %v2765_v49 = vshll.u32 %v2735_v33, 16  ;;  %v2767_v50 = vpack.c.bf16 %v189_v41, %v188_v40  ;;  %v199_v35 = vld [vmem:[%s2690_s17 + $0xd8] sm:$0xff] }
  0x1a   : > { %532 = vrot.lane.b32.xlu1 %v451_v42, %s2651_s19  ;;  %v450_v43 = vsel %vm2725_vm2, %v384_v36, %v2714_v20  ;;  %v452_v47 = vsel %vm2725_vm2, %v388_v37, %v2716_v21  ;;  %v390_v51 = vor.u32 %v389_v39, %v2741_v38  ;;  %v2771_v52 = vshll.u32 %v2756_v46, 16 }
  0x1b   : > { %530 = vrot.lane.b32.xlu0 %v450_v43, %s2651_s19  ;;  %v392_v55 = vor.u32 %v391_v45, %v2753_v44  ;;  %v2777_v56 = vshrl.u32 %v209_v32, 16  ;;  %v2783_v59 = vshrl.u32 %v2735_v33, 16  ;;  %v393_v60 = vrot.slane %v2762_v48, 1 }
  0x1c   : > { %v395_v61 = vrot.slane %v2765_v49, 1  ;;  %v2788_v62 = vshll.u32 %v2767_v50, 16  ;;  %v453_v63 = vsel %vm2725_vm2, %v390_v51, %v2721_v26  ;;  %v2793_v0 = vpack.c.bf16 %v191_v54, %v190_v53 }
  0x1d   : > { %v2796_v1 = vshrl.u32 %v2756_v46, 16  ;;  %v397_v2 = vrot.slane %v2771_v52, 1  ;;  %v2799_v3 = vpack.c.bf16 %v193_v58, %v192_v57  ;;  %v454_v4 = vsel %vm2725_vm2, %v392_v55, %v2733_v31 }
  0x1e   : > { %534 = vrot.lane.b32.xlu1 %v452_v47, %s2651_s19  ;;  %v394_v5 = vor.u32 %v393_v60, %v2777_v56  ;;  %v396_v6 = vor.u32 %v395_v61, %v2783_v59  ;;  %v2809_v7 = vshrl.u32 %v2767_v50, 16  ;;  %v399_v8 = vrot.slane %v2788_v62, 1 }
  0x1f   : > { %488 = vrot.lane.b32.xlu0 %v207_v14, %s2650_s18  ;;  %v2815_v11 = vshll.u32 %v2793_v0, 16  ;;  %v2818_v14 = vor.u32 %v397_v2, %v2796_v1  ;;  %v2821_v15 = vshll.u32 %v2799_v3, 16  ;;  %v2825_v16 = vshrl.u32 %v2793_v0, 16 }
  0x20   : > { %v2827_v17 = vpack.c.bf16 %v195_v10, %v194_v9  ;;  %v455_v24 = vsel %vm2725_vm2, %v394_v5, %v2762_v48  ;;  %v2839_v28 = vor.u32 %v399_v8, %v2809_v7  ;;  %v2842_v29 = vshrl.u32 %v2799_v3, 16 }
  0x21   : > { %v401_v30 = vrot.slane %v2815_v11, 1  ;;  %v288_v36 = vrot.slane %v2702_v12, 7  ;;  %v292_v37 = vrot.slane %v2710_v18, 7  ;;  %v457_v39 = vsel %vm2725_vm2, %v2818_v14, %v2771_v52 }
  0x22   : > { %490 = vrot.lane.b32.xlu1 %v208_v25, %s2650_s18  ;;  %v456_v25 = vsel %vm2725_vm2, %v396_v6, %v2765_v49  ;;  %v2846_v34 = vshrl.u32 %v2827_v17, 16  ;;  %v403_v40 = vrot.slane %v2821_v15, 1  ;;  %v2857_v41 = vpack.c.bf16 %v197_v23, %v196_v22 }
  0x23   : > { %536 = vrot.lane.b32.xlu0 %v453_v63, %s2651_s19  ;;  %v284_v43 = vrot.slane %v2712_v19, 7  ;;  %v2869_v45 = vshll.u32 %v2827_v17, 16  ;;  %v2872_v47 = vor.u32 %v2704_v13, %v288_v36  ;;  %v2875_v51 = vor.u32 %v2716_v21, %v292_v37 }
  0x24   : > { %v296_v53 = vrot.slane %v2741_v38, 7  ;;  %v458_v54 = vsel %vm2725_vm2, %v2839_v28, %v2788_v62  ;;  %v300_v13 = vrot.slane %v2753_v44, 7  ;;  %v2890_v57 = vshrl.u32 %v2857_v41, 16 }
  0x25   : > { %v368_v21 = vsel %vm2861_vm5, %v2702_v12, %v2872_v47  ;;  %v369_v58 = vsel %vm2861_vm5, %v2710_v18, %v2875_v51  ;;  %v304_v2 = vrot.slane %v2777_v56, 7  ;;  %v312_v5 = vrot.slane %v2796_v1, 7 }
  0x26   : > { %538 = vrot.lane.b32.xlu1 %v454_v4, %s2651_s19  ;;  %v2901_v60 = vor.u32 %v2721_v26, %v296_v53  ;;  %v2911_v63 = vor.u32 %v2733_v31, %v300_v13  ;;  %v308_v4 = vrot.slane %v2783_v59, 7  ;;  %v316_v6 = vrot.slane %v2809_v7, 7 }
  0x27   : > { %492 = vrot.lane.b32.xlu0 %v209_v32, %s2650_s18  ;;  %v198_v32 = vld [vmem:[%s2690_s17 + $0xd0] sm:$0xff]  ;;  %v2929_v8 = vor.u32 %v2762_v48, %v304_v2  ;;  %v320_v9 = vrot.slane %v2825_v16, 7  ;;  %v324_v10 = vrot.slane %v2842_v29, 7  ;;  %v2937_v22 = vor.u32 %v2771_v52, %v312_v5  ;;  %v200_v52 = vld [vmem:[%s2690_s17 + $0xe0] sm:$0xff]  ;;  %v203_v5 = vld [vmem:[%s2690_s17 + $0xf8] sm:$0xff] }
  0x28   : > { %v2883_v55 = vpack.c.bf16 %v199_v35, %v198_v32  ;;  %v370_v26 = vsel %vm2861_vm5, %v2741_v38, %v2901_v60  ;;  %v371_v31 = vsel %vm2861_vm5, %v2753_v44, %v2911_v63  ;;  %v2934_v14 = vor.u32 %v2765_v49, %v308_v4 }
  0x29   : > { %v328_v23 = vrot.slane %v2846_v34, 7  ;;  %v372_v48 = vsel %vm2861_vm5, %v2777_v56, %v2929_v8  ;;  %v332_v49 = vrot.slane %v2890_v57, 7  ;;  %v374_v32 = vsel %vm2861_vm5, %v2796_v1, %v2937_v22 }
  0x2a   : > { %494 = vrot.lane.b32.xlu1 %v2735_v33, %s2650_s18  ;;  %v2886_v33 = vor.u32 %v2714_v20, %v284_v43  ;;  %v2904_v20 = vshll.u32 %v2857_v41, 16  ;;  %v373_v28 = vsel %vm2861_vm5, %v2783_v59, %v2934_v14  ;;  %v337_v4 = vshll.u32 %v2883_v55, 16 }
  0x2b   : > { %540 = vrot.lane.b32.xlu0 %v455_v24, %s2651_s19  ;;  %v2948_v24 = vor.u32 %v2815_v11, %v320_v9  ;;  %v2971_v36 = vor.u32 %v2869_v45, %v328_v23 }
  0x2c   : > { %v367_v61 = vsel %vm2861_vm5, %v2712_v19, %v2886_v33  ;;  %v2986_v53 = vor.u32 %v2904_v20, %v332_v49  ;;  %v405_v49 = vrot.slane %v2869_v45, 1 }
  0x2d   : > { %v376_v37 = vsel %vm2861_vm5, %v2825_v16, %v2948_v24 }
  0x2e   : > { %542 = vrot.lane.b32.xlu1 %v456_v25, %s2651_s19  ;;  %v2951_v25 = vor.u32 %v2821_v15, %v324_v10 }
  0x2f   : > { %496 = vrot.lane.b32.xlu0 %v2756_v46, %s2650_s18  ;;  %v2940_v46 = vor.u32 %v2788_v62, %v316_v6  ;;  %v201_v62 = vld [vmem:[%s2690_s17 + $0xe8] sm:$0xff] }
  0x30   : > { %v377_v43 = vsel %vm2861_vm5, %v2842_v29, %v2951_v25  ;;  %v218_v2 = vpack.c.bf16 %v201_v62, %v200_v52  ;;  %v202_v62 = vld [vmem:[%s2690_s17 + $0xf0] sm:$0xff] }
  0x31   : > { %v375_v35 = vsel %vm2861_vm5, %v2809_v7, %v2940_v46  ;;  %v219_v13 = vpack.c.bf16 %v203_v5, %v202_v62 }
  0x32   : > { %498 = vrot.lane.b32.xlu1 %v2767_v50, %s2650_s18  ;;  %v2975_v50 = vshrl.u32 %v2883_v55, 16  ;;  %v3003_v9 = vshrl.u32 %v218_v2, 16  ;;  %v341_v52 = vshll.u32 %v218_v2, 16 }
  0x33   : > { %544 = vrot.lane.b32.xlu0 %v457_v39, %s2651_s19  ;;  %v402_v39 = vor.u32 %v401_v30, %v2825_v16  ;;  %v404_v30 = vor.u32 %v403_v40, %v2842_v29  ;;  %v345_v5 = vshll.u32 %v219_v13, 16 }
  0x34   : > { %v336_v6 = vrot.slane %v2975_v50, 7  ;;  %v340_v40 = vrot.slane %v3003_v9, 7 }
  0x35   : > { %v459_v23 = vsel %vm2725_vm2, %v402_v39, %v2815_v11  ;;  %v460_v11 = vsel %vm2725_vm2, %v404_v30, %v2821_v15 }
  0x36   : > { %546 = vrot.lane.b32.xlu1 %v458_v54, %s2651_s19  ;;  %v3005_v10 = vor.u32 %v337_v4, %v336_v6  ;;  %v407_v54 = vrot.slane %v2904_v20, 1  ;;  %v3025_v39 = vor.u32 %v341_v52, %v340_v40  ;;  %v406_v6 = vor.u32 %v405_v49, %v2846_v34 }
  0x37   : > { %500 = vrot.lane.b32.xlu0 %v2793_v0, %s2650_s18  ;;  %v411_v40 = vrot.slane %v341_v52, 1 }
  0x38   : > { %v381_v0 = vsel %vm2861_vm5, %v3003_v9, %v3025_v39  ;;  %v408_v15 = vor.u32 %v407_v54, %v2890_v57  ;;  %v461_v30 = vsel %vm2725_vm2, %v406_v6, %v2869_v45  ;;  %v413_v54 = vrot.slane %v345_v5, 1 }
  0x3a   : > { %502 = vrot.lane.b32.xlu1 %v2799_v3, %s2650_s18  ;;  %v3033_v3 = vshrl.u32 %v219_v13, 16 }
  0x3b   : > { %548 = vrot.lane.b32.xlu0 %v459_v23, %s2651_s19  ;;  %v409_v23 = vrot.slane %v337_v4, 1 }
  0x3c   : > { %v344_v49 = vrot.slane %v3033_v3, 7 }
  0x3e   : > { %550 = vrot.lane.b32.xlu1 %v460_v11, %s2651_s19  ;;  %v3044_v62 = vor.u32 %v345_v5, %v344_v49  ;;  %v410_v11 = vor.u32 %v409_v23, %v2975_v50 }
  0x3f   : > { %504 = vrot.lane.b32.xlu0 %v2827_v17, %s2650_s18  ;;  %v462_v17 = vsel %vm2725_vm2, %v408_v15, %v2904_v20  ;;  %v2600_v20 = vld [vmem:[%s4819_s1] sm:$0xff]   ;;  %v2601_v15 = vld [vmem:[%s4819_s1 + $0x8] sm:$0xff]  }
  0x40   : > { %v382_v45 = vsel %vm2861_vm5, %v3033_v3, %v3044_v62  ;;  %v463_v6 = vsel %vm2725_vm2, %v410_v11, %v337_v4  ;;  %2510 = vmatprep.subr.bf16.mxu0 %v2600_v20  ;;  %v2602_v4 = vld [vmem:[%s4819_s1 + $0x10] ss:$0 sps:$4 sm:$0x33]  }
  0x41   : > { %2511 = vmatpush3.bf16.msra.mxu0 %v2600_v20 }
  0x42   : > { %506 = vrot.lane.b32.xlu1 %v2857_v41, %s2650_s18  ;;  %v412_v41 = vor.u32 %v411_v40, %v3003_v9  ;;  %2512 = vmatprep.subr.bf16.mxu0 %v2601_v15 }
  0x43   : > { %552 = vrot.lane.b32.xlu0 %v461_v30, %s2651_s19  ;;  %v414_v30 = vor.u32 %v413_v54, %v3033_v3 }
  0x45   : > { %2513 = vmatpush3.bf16.msra.mxu0 %v2601_v15 }
  0x46   : > { %554 = vrot.lane.b32.xlu1 %v462_v17, %s2651_s19  ;;  %2586 = vmatprep.subr.msk.bf16.mxu0 %vm840_vm6, %v2602_v4 }
  0x47   : > { %508 = vrot.lane.b32.xlu0 %v2883_v55, %s2650_s18  ;;  %v464_v55 = vsel %vm2725_vm2, %v412_v41, %v341_v52  ;;  %v842_v52 = vsel %vm840_vm6, %v2602_v4, 0 }
  0x49   : > { %2515 = vmatpush3.bf16.msra.mxu0 %v842_v52  ;;  %v4826_v52 = vsel %vm2861_vm5, %v2846_v34, %v2971_v36 }
  0x4a   : > { %510 = vrot.lane.b32.xlu1 %v218_v2, %s2650_s18  ;;  %v465_v2 = vsel %vm2725_vm2, %v414_v30, %v345_v5 }
  0x4b   : > { %556 = vrot.lane.b32.xlu0 %v463_v6, %s2651_s19 }
  0x4e   : > { %558 = vrot.lane.b32.xlu1 %v464_v55, %s2651_s19 }
  0x4f   : > { %512 = vrot.lane.b32.xlu0 %v219_v13, %s2650_s18 }
  0x52   : > { %560 = vrot.lane.b32.xlu1 %v465_v2, %s2651_s19 }
  0x85   : > { %v485_v23 = vpop.permute.xlu0 %484 }
  0x86   : > { %v487_v49 = vpop.permute.xlu1 %486  ;;  %v568_v5 = vsel %vm562_vm7, %v368_v21, %v485_v23  ;;  %v4827_v23 = vsel %vm2861_vm5, %v2890_v57, %v2986_v53 }
  0x87   : > { %v571_v12 = vsel %vm562_vm7, %v369_v58, %v487_v49 }
  0x89   : > { %v483_v13 = vpop.permute.xlu0 %482 }
  0x8a   : > { %v565_v40 = vsel %vm562_vm7, %v367_v61, %v483_v13 }
  0x8c   : > { %v533_v17 = vpop.permute.xlu1 %532 }
  0x8d   : > { %v531_v11 = vpop.permute.xlu0 %530  ;;  %v3095_v41 = vsel %vm611_vm8, %v568_v5, %v533_v17  ;;  %v4828_v17 = vsel %vm2861_vm5, %v2975_v50, %v3005_v10 }
  0x8e   : > { %v3098_v54 = vsel %vm611_vm8, %v565_v40, %v531_v11  ;;  %660 = vrot.lane.b32.xlu0 %v3095_v41, %s2652_s26 }
  0x8f   : > { %662 = vrot.lane.b32.xlu1 %v3098_v54, %s2652_s26 }
  0x90   : > { %v535_v19 = vpop.permute.xlu1 %534 }
  0x91   : > { %v489_v47 = vpop.permute.xlu0 %488  ;;  %v3111_v33 = vsel %vm611_vm8, %v571_v12, %v535_v19 }
  0x92   : > { %692 = vrot.lane.b32.xlu0 %v3098_v54, %s2653_s27  ;;  %v574_v18 = vsel %vm562_vm7, %v370_v26, %v489_v47 }
  0x93   : > { %694 = vrot.lane.b32.xlu1 %v3111_v33, %s2653_s27 }
  0x94   : > { %v491_v21 = vpop.permute.xlu1 %490 }
  0x95   : > { %v537_v51 = vpop.permute.xlu0 %536  ;;  %v577_v61 = vsel %vm562_vm7, %v371_v31, %v491_v21 }
  0x96   : > { %664 = vrot.lane.b32.xlu0 %v3111_v33, %s2652_s26  ;;  %v3126_v58 = vsel %vm611_vm8, %v574_v18, %v537_v51 }
  0x97   : > { %666 = vrot.lane.b32.xlu1 %v3126_v58, %s2652_s26 }
  0x98   : > { %v539_v38 = vpop.permute.xlu1 %538 }
  0x99   : > { %v493_v60 = vpop.permute.xlu0 %492  ;;  %v3137_v26 = vsel %vm611_vm8, %v577_v61, %v539_v38 }
  0x9a   : > { %696 = vrot.lane.b32.xlu0 %v3126_v58, %s2653_s27  ;;  %v580_v44 = vsel %vm562_vm7, %v372_v48, %v493_v60 }
  0x9b   : > { %698 = vrot.lane.b32.xlu1 %v3137_v26, %s2653_s27 }
  0x9c   : > { %v495_v6 = vpop.permute.xlu1 %494 }
  0x9d   : > { %v541_v63 = vpop.permute.xlu0 %540  ;;  %v583_v20 = vsel %vm562_vm7, %v373_v28, %v495_v6 }
  0x9e   : > { %668 = vrot.lane.b32.xlu0 %v3137_v26, %s2652_s26  ;;  %v3152_v31 = vsel %vm611_vm8, %v580_v44, %v541_v63 }
  0x9f   : > { %670 = vrot.lane.b32.xlu1 %v3152_v31, %s2652_s26 }
  0xa0   : > { %v543_v56 = vpop.permute.xlu1 %542 }
  0xa1   : > { %v497_v8 = vpop.permute.xlu0 %496  ;;  %v3163_v48 = vsel %vm611_vm8, %v583_v20, %v543_v56 }
  0xa2   : > { %700 = vrot.lane.b32.xlu0 %v3152_v31, %s2653_s27  ;;  %v586_v59 = vsel %vm562_vm7, %v374_v32, %v497_v8 }
  0xa3   : > { %702 = vrot.lane.b32.xlu1 %v3163_v48, %s2653_s27 }
  0xa4   : > { %v499_v15 = vpop.permute.xlu1 %498 }
  0xa5   : > { %v545_v14 = vpop.permute.xlu0 %544  ;;  %v589_v55 = vsel %vm562_vm7, %v375_v35, %v499_v15 }
  0xa6   : > { %672 = vrot.lane.b32.xlu0 %v3163_v48, %s2652_s26  ;;  %v3178_v28 = vsel %vm611_vm8, %v586_v59, %v545_v14 }
  0xa7   : > { %674 = vrot.lane.b32.xlu1 %v3178_v28, %s2652_s26 }
  0xa8   : > { %v547_v1 = vpop.permute.xlu1 %546 }
  0xa9   : > { %v501_v22 = vpop.permute.xlu0 %500  ;;  %v3189_v32 = vsel %vm611_vm8, %v589_v55, %v547_v1 }
  0xaa   : > { %704 = vrot.lane.b32.xlu0 %v3178_v28, %s2653_s27  ;;  %v592_v7 = vsel %vm562_vm7, %v376_v37, %v501_v22 }
  0xab   : > { %706 = vrot.lane.b32.xlu1 %v3189_v32, %s2653_s27 }
  0xac   : > { %v503_v30 = vpop.permute.xlu1 %502 }
  0xad   : > { %v549_v46 = vpop.permute.xlu0 %548  ;;  %v595_v2 = vsel %vm562_vm7, %v377_v43, %v503_v30 }
  0xae   : > { %676 = vrot.lane.b32.xlu0 %v3189_v32, %s2652_s26  ;;  %v3204_v35 = vsel %vm611_vm8, %v592_v7, %v549_v46 }
  0xaf   : > { %678 = vrot.lane.b32.xlu1 %v3204_v35, %s2652_s26 }
  0xb0   : > { %v551_v16 = vpop.permute.xlu1 %550 }
  0xb1   : > { %v505_v24 = vpop.permute.xlu0 %504  ;;  %v3215_v37 = vsel %vm611_vm8, %v595_v2, %v551_v16 }
  0xb2   : > { %708 = vrot.lane.b32.xlu0 %v3204_v35, %s2653_s27  ;;  %v598_v29 = vsel %vm562_vm7, %v4826_v52, %v505_v24 }
  0xb3   : > { %710 = vrot.lane.b32.xlu1 %v3215_v37, %s2653_s27 }
  0xb4   : > { %v507_v4 = vpop.permute.xlu1 %506 }
  0xb5   : > { %v553_v25 = vpop.permute.xlu0 %552  ;;  %v601_v49 = vsel %vm562_vm7, %v4827_v23, %v507_v4 }
  0xb6   : > { %680 = vrot.lane.b32.xlu0 %v3215_v37, %s2652_s26  ;;  %v3230_v43 = vsel %vm611_vm8, %v598_v29, %v553_v25 }
  0xb7   : > { %682 = vrot.lane.b32.xlu1 %v3230_v43, %s2652_s26 }
  0xb8   : > { %v555_v34 = vpop.permute.xlu1 %554 }
  0xb9   : > { %v509_v36 = vpop.permute.xlu0 %508  ;;  %v3241_v13 = vsel %vm611_vm8, %v601_v49, %v555_v34 }
  0xba   : > { %712 = vrot.lane.b32.xlu0 %v3230_v43, %s2653_s27  ;;  %v604_v57 = vsel %vm562_vm7, %v4828_v17, %v509_v36 }
  0xbb   : > { %714 = vrot.lane.b32.xlu1 %v3241_v13, %s2653_s27 }
  0xbc   : > { %v511_v5 = vpop.permute.xlu1 %510 }
  0xbd   : > { %v557_v53 = vpop.permute.xlu0 %556  ;;  %v607_v11 = vsel %vm562_vm7, %v381_v0, %v511_v5 }
  0xbe   : > { %684 = vrot.lane.b32.xlu0 %v3241_v13, %s2652_s26  ;;  %v3256_v40 = vsel %vm611_vm8, %v604_v57, %v557_v53 }
  0xbf   : > { %686 = vrot.lane.b32.xlu1 %v3256_v40, %s2652_s26 }
  0xc0   : > { %v559_v50 = vpop.permute.xlu1 %558 }
  0xc1   : > { %v3267_v10 = vsel %vm611_vm8, %v607_v11, %v559_v50  ;;  %v513_v12 = vpop.permute.xlu0 %512 }
  0xc2   : > { %716 = vrot.lane.b32.xlu0 %v3256_v40, %s2653_s27  ;;  %v610_v19 = vsel %vm562_vm7, %v382_v45, %v513_v12 }
  0xc3   : > { %718 = vrot.lane.b32.xlu1 %v3267_v10, %s2653_s27 }
  0xc4   : > { %v561_v9 = vpop.permute.xlu1 %560 }
  0xc5   : > { %v643_v0 = vsel %vm611_vm8, %v610_v19, %v561_v9 }
  0xc6   : > { %688 = vrot.lane.b32.xlu0 %v3267_v10, %s2652_s26 }
  0xc7   : > { %690 = vrot.lane.b32.xlu1 %v643_v0, %s2652_s26 }
  0xca   : > { %720 = vrot.lane.b32.xlu0 %v643_v0, %s2653_s27 }
 0x100   : > { %v661_v39 = vpop.permute.xlu0 %660 }
 0x101   : > { %v663_v47 = vpop.permute.xlu1 %662  ;;  %v724_v3 = vsel %vm722_vm9, %v3098_v54, %v661_v39 }
 0x102   : > { %v726_v45 = vsel %vm722_vm9, %v3095_v41, %v663_v47 }
 0x104   : > { %v693_v62 = vpop.permute.xlu0 %692 }
 0x105   : > { %v695_v21 = vpop.permute.xlu1 %694  ;;  %v757_v18 = vsel %vm755_vm10, %v724_v3, %v693_v62 }
 0x106   : > { %v759_v51 = vsel %vm755_vm10, %v726_v45, %v695_v21  ;;  %2516 = vmatprep.mubr.msk.bf16.mxu0 %vm807_vm11, %v757_v18 }
 0x107   : > { %2517 = vmatmul.mubr.msk.bf16.vlgmr.msra.gmra.mrb[0].mxu0 %vm807_vm11, %v759_v51 }
 0x108   : > { %v665_v61 = vpop.permute.xlu0 %664 }
 0x109   : > { %v667_v38 = vpop.permute.xlu1 %666  ;;  %v728_v60 = vsel %vm722_vm9, %v3098_v54, %v665_v61 }
 0x10a   : > { %v730_v44 = vsel %vm722_vm9, %v3111_v33, %v667_v38 }
 0x10c   : > { %v697_v6 = vpop.permute.xlu0 %696 }
 0x10d   : > { %v761_v41 = vsel %vm755_vm10, %v728_v60, %v697_v6  ;;  %v699_v63 = vpop.permute.xlu1 %698 }
 0x10e   : > { %v763_v20 = vsel %vm755_vm10, %v730_v44, %v699_v63  ;;  %2520 = vmatprep.mubr.msk.bf16.mxu0 %vm807_vm11, %v761_v41 }
 0x10f   : > { %2521 = vmatmul.mubr.msk.bf16.gmra.mrb[4].mxu0 %vm807_vm11, %v763_v20 }
 0x110   : > { %v669_v56 = vpop.permute.xlu0 %668 }
 0x111   : > { %v671_v8 = vpop.permute.xlu1 %670  ;;  %v732_v15 = vsel %vm722_vm9, %v3126_v58, %v669_v56 }
 0x112   : > { %v734_v54 = vsel %vm722_vm9, %v3137_v26, %v671_v8 }
 0x114   : > { %v701_v59 = vpop.permute.xlu0 %700 }
 0x115   : > { %v765_v33 = vsel %vm755_vm10, %v732_v15, %v701_v59  ;;  %v703_v14 = vpop.permute.xlu1 %702 }
 0x116   : > { %v767_v55 = vsel %vm755_vm10, %v734_v54, %v703_v14  ;;  %2524 = vmatprep.mubr.msk.bf16.mxu0 %vm807_vm11, %v765_v33 }
 0x117   : > { %2525 = vmatmul.mubr.msk.bf16.gmra.mrb[8].mxu0 %vm807_vm11, %v767_v55 }
 0x118   : > { %v673_v1 = vpop.permute.xlu0 %672 }
 0x119   : > { %v675_v22 = vpop.permute.xlu1 %674  ;;  %v736_v30 = vsel %vm722_vm9, %v3152_v31, %v673_v1 }
 0x11a   : > { %v738_v58 = vsel %vm722_vm9, %v3163_v48, %v675_v22 }
 0x11c   : > { %v705_v7 = vpop.permute.xlu0 %704 }
 0x11d   : > { %v769_v26 = vsel %vm755_vm10, %v736_v30, %v705_v7  ;;  %v707_v46 = vpop.permute.xlu1 %706 }
 0x11e   : > { %v771_v2 = vsel %vm755_vm10, %v738_v58, %v707_v46  ;;  %2528 = vmatprep.mubr.msk.bf16.mxu0 %vm807_vm11, %v769_v26 }
 0x11f   : > { %2529 = vmatmul.mubr.msk.bf16.gmra.mrb[12].mxu0 %vm807_vm11, %v771_v2 }
 0x120   : > { %v677_v16 = vpop.permute.xlu0 %676 }
 0x121   : > { %v679_v24 = vpop.permute.xlu1 %678  ;;  %v740_v4 = vsel %vm722_vm9, %v3178_v28, %v677_v16 }
 0x122   : > { %v742_v31 = vsel %vm722_vm9, %v3189_v32, %v679_v24 }
 0x124   : > { %v709_v52 = vpop.permute.xlu0 %708 }
 0x125   : > { %v773_v48 = vsel %vm755_vm10, %v740_v4, %v709_v52  ;;  %v711_v29 = vpop.permute.xlu1 %710 }
 0x126   : > { %v775_v25 = vsel %vm755_vm10, %v742_v31, %v711_v29  ;;  %2532 = vmatprep.mubr.msk.bf16.mxu0 %vm807_vm11, %v773_v48 }
 0x127   : > { %2533 = vmatmul.mubr.msk.bf16.gmra.mrb[16].mxu0 %vm807_vm11, %v775_v25 }
 0x128   : > { %v681_v23 = vpop.permute.xlu0 %680 }
 0x129   : > { %v683_v49 = vpop.permute.xlu1 %682  ;;  %v744_v34 = vsel %vm722_vm9, %v3204_v35, %v681_v23 }
 0x12a   : > { %v746_v28 = vsel %vm722_vm9, %v3215_v37, %v683_v49 }
 0x12c   : > { %v713_v36 = vpop.permute.xlu0 %712 }
 0x12d   : > { %v777_v32 = vsel %vm755_vm10, %v744_v34, %v713_v36  ;;  %v715_v5 = vpop.permute.xlu1 %714 }
 0x12e   : > { %v779_v17 = vsel %vm755_vm10, %v746_v28, %v715_v5  ;;  %2536 = vmatprep.mubr.msk.bf16.mxu0 %vm807_vm11, %v777_v32 }
 0x12f   : > { %2537 = vmatmul.mubr.msk.bf16.gmra.mrb[20].mxu0 %vm807_vm11, %v779_v17 }
 0x130   : > { %v685_v57 = vpop.permute.xlu0 %684 }
 0x131   : > { %v687_v53 = vpop.permute.xlu1 %686  ;;  %v748_v11 = vsel %vm722_vm9, %v3230_v43, %v685_v57 }
 0x132   : > { %v750_v35 = vsel %vm722_vm9, %v3241_v13, %v687_v53 }
 0x134   : > { %v717_v50 = vpop.permute.xlu0 %716 }
 0x135   : > { %v781_v37 = vsel %vm755_vm10, %v748_v11, %v717_v50  ;;  %v719_v12 = vpop.permute.xlu1 %718 }
 0x136   : > { %v783_v19 = vsel %vm755_vm10, %v750_v35, %v719_v12  ;;  %2540 = vmatprep.mubr.msk.bf16.mxu0 %vm807_vm11, %v781_v37 }
 0x137   : > { %2541 = vmatmul.mubr.msk.bf16.gmra.mrb[24].mxu0 %vm807_vm11, %v783_v19 }
 0x138   : > { %v689_v9 = vpop.permute.xlu0 %688 }
 0x139   : > { %v691_v0 = vpop.permute.xlu1 %690  ;;  %v752_v43 = vsel %vm722_vm9, %v3256_v40, %v689_v9 }
 0x13a   : > { %v754_v39 = vsel %vm722_vm9, %v3267_v10, %v691_v0 }
 0x13b   : > { %v786_v3 = vsel %vm755_vm10, %v754_v39, %v719_v12 }
 0x13c   : > { %v721_v47 = vpop.permute.xlu0 %720 }
 0x13d   : > { %v785_v13 = vsel %vm755_vm10, %v752_v43, %v721_v47 }
 0x13e   : > { %2544 = vmatprep.mubr.msk.bf16.mxu0 %vm807_vm11, %v785_v13 }
 0x13f   : > { %2545 = vmatmul.mubr.msk.bf16.gmra.mrb[28].mxu0 %vm807_vm11, %v786_v3 }
 0x1da   : > { %v3348_v62 = vpop.f32.mrb[0].mxu0 }
 0x1db   : > { %v3350_v45 = vpop.f32.mrb[1].mxu0  ;;  %v1008_v61 = vsel %vm562_vm7, %v3348_v62, 0.0 }
 0x1dc   : > { %v3352_v21 = vpop.f32.mrb[2].mxu0  ;;  %v1005_v40 = vsel %vm562_vm7, %v3350_v45, 0.0 }
 0x1dd   : > { %v3354_v18 = vpop.f32.mrb[3].mxu0  ;;  %v1010_v60 = vsel %vm562_vm7, %v3352_v21, 0.0 }
 0x1de   : > { %v1006_v10 = vsel %vm562_vm7, %v3354_v18, 0.0 }
 0x1df   : > { %v1007_v51 = vadd.f32 %v1006_v10, %v1005_v40 }
 0x1e1   : > { %v1009_v38 = vadd.f32 %v1008_v61, %v1007_v51 }
 0x1e2   : > { %v3364_v6 = vpop.f32.mrb[4].mxu0 }
 0x1e3   : > { %v3366_v44 = vpop.f32.mrb[5].mxu0  ;;  %v1011_v41 = vadd.f32 %v1010_v60, %v1009_v38  ;;  %v1016_v54 = vsel %vm562_vm7, %v3364_v6, 0.0 }
 0x1e4   : > { %v1012_v63 = vsel %vm562_vm7, %v3366_v44, 0.0  ;;  %v3370_v20 = vpop.f32.mrb[6].mxu0 }
 0x1e5   : > { %v1013_v56 = vadd.f32 %v1012_v63, %v1011_v41  ;;  %v3372_v8 = vpop.f32.mrb[7].mxu0  ;;  %v1018_v14 = vsel %vm562_vm7, %v3370_v20, 0.0 }
 0x1e6   : > { %v1014_v15 = vsel %vm562_vm7, %v3372_v8, 0.0 }
 0x1e7   : > { %v1015_v59 = vadd.f32 %v1014_v15, %v1013_v56 }
 0x1e9   : > { %v1017_v33 = vadd.f32 %v1016_v54, %v1015_v59 }
 0x1ea   : > { %v3380_v55 = vpop.f32.mrb[8].mxu0 }
 0x1eb   : > { %v3382_v1 = vpop.f32.mrb[9].mxu0  ;;  %v1019_v22 = vadd.f32 %v1018_v14, %v1017_v33  ;;  %v1024_v16 = vsel %vm562_vm7, %v3380_v55, 0.0 }
 0x1ec   : > { %v1020_v30 = vsel %vm562_vm7, %v3382_v1, 0.0  ;;  %v3386_v7 = vpop.f32.mrb[10].mxu0 }
 0x1ed   : > { %v1021_v58 = vadd.f32 %v1020_v30, %v1019_v22  ;;  %v3388_v26 = vpop.f32.mrb[11].mxu0  ;;  %v1026_v4 = vsel %vm562_vm7, %v3386_v7, 0.0 }
 0x1ee   : > { %v1022_v46 = vsel %vm562_vm7, %v3388_v26, 0.0 }
 0x1ef   : > { %v1023_v2 = vadd.f32 %v1022_v46, %v1021_v58 }
 0x1f1   : > { %v1025_v24 = vadd.f32 %v1024_v16, %v1023_v2 }
 0x1f2   : > { %v3396_v52 = vpop.f32.mrb[12].mxu0 }
 0x1f3   : > { %v3398_v31 = vpop.f32.mrb[13].mxu0  ;;  %v1027_v48 = vadd.f32 %v1026_v4, %v1025_v24  ;;  %v1032_v28 = vsel %vm562_vm7, %v3396_v52, 0.0 }
 0x1f4   : > { %v1028_v29 = vsel %vm562_vm7, %v3398_v31, 0.0  ;;  %v3402_v25 = vpop.f32.mrb[14].mxu0 }
 0x1f5   : > { %v1029_v23 = vadd.f32 %v1028_v29, %v1027_v48  ;;  %v3404_v49 = vpop.f32.mrb[15].mxu0  ;;  %v1034_v5 = vsel %vm562_vm7, %v3402_v25, 0.0 }
 0x1f6   : > { %v1030_v34 = vsel %vm562_vm7, %v3404_v49, 0.0 }
 0x1f7   : > { %v1031_v36 = vadd.f32 %v1030_v34, %v1029_v23 }
 0x1f9   : > { %v1033_v32 = vadd.f32 %v1032_v28, %v1031_v36 }
 0x1fa   : > { %v3412_v17 = vpop.f32.mrb[16].mxu0 }
 0x1fb   : > { %v3414_v57 = vpop.f32.mrb[17].mxu0  ;;  %v1035_v53 = vadd.f32 %v1034_v5, %v1033_v32  ;;  %v1040_v9 = vsel %vm562_vm7, %v3412_v17, 0.0 }
 0x1fc   : > { %v1036_v11 = vsel %vm562_vm7, %v3414_v57, 0.0  ;;  %v3418_v50 = vpop.f32.mrb[18].mxu0 }
 0x1fd   : > { %v1037_v35 = vadd.f32 %v1036_v11, %v1035_v53  ;;  %v3420_v37 = vpop.f32.mrb[19].mxu0  ;;  %v1042_v39 = vsel %vm562_vm7, %v3418_v50, 0.0 }
 0x1fe   : > { %v1038_v12 = vsel %vm562_vm7, %v3420_v37, 0.0 }
 0x1ff   : > { %v1039_v19 = vadd.f32 %v1038_v12, %v1037_v35 }
 0x201   : > { %v1041_v0 = vadd.f32 %v1040_v9, %v1039_v19 }
 0x202   : > { %v3428_v43 = vpop.f32.mrb[20].mxu0 }
 0x203   : > { %v3430_v47 = vpop.f32.mrb[21].mxu0  ;;  %v1043_v13 = vadd.f32 %v1042_v39, %v1041_v0  ;;  %v1048_v60 = vsel %vm562_vm7, %v3428_v43, 0.0 }
 0x204   : > { %v1044_v3 = vsel %vm562_vm7, %v3430_v47, 0.0  ;;  %v3434_v40 = vpop.f32.mrb[22].mxu0 }
 0x205   : > { %v1045_v10 = vadd.f32 %v1044_v3, %v1043_v13  ;;  %v961_v51 = vpop.f32.mrb[23].mxu0  ;;  %v1050_v63 = vsel %vm562_vm7, %v3434_v40, 0.0 }
 0x206   : > { %v1046_v61 = vsel %vm562_vm7, %v961_v51, 0.0 }
 0x207   : > { %v1047_v38 = vadd.f32 %v1046_v61, %v1045_v10 }
 0x209   : > { %v1049_v41 = vadd.f32 %v1048_v60, %v1047_v38 }
 0x20a   : > { %v2542_v56 = vpop.f32.mrb[24].mxu0 }
 0x20b   : > { %v974_v15 = vpop.f32.mrb[25].mxu0  ;;  %v1051_v59 = vadd.f32 %v1050_v63, %v1049_v41  ;;  %v1056_v46 = vsel %vm562_vm7, %v2542_v56, 0.0 }
 0x20c   : > { %v1052_v54 = vsel %vm562_vm7, %v974_v15, 0.0  ;;  %v2543_v33 = vpop.f32.mrb[26].mxu0 }
 0x20d   : > { %v1053_v14 = vadd.f32 %v1052_v54, %v1051_v59  ;;  %v977_v22 = vpop.f32.mrb[27].mxu0  ;;  %v1058_v16 = vsel %vm562_vm7, %v2543_v33, 0.0 }
 0x20e   : > { %v1054_v30 = vsel %vm562_vm7, %v977_v22, 0.0 }
 0x20f   : > { %v1055_v58 = vadd.f32 %v1054_v30, %v1053_v14 }
 0x211   : > { %v1057_v2 = vadd.f32 %v1056_v46, %v1055_v58 }
 0x212   : > { %v2546_v24 = vpop.f32.mrb[28].mxu0 }
 0x213   : > { %v990_v4 = vpop.f32.mrb[29].mxu0  ;;  %v1059_v48 = vadd.f32 %v1058_v16, %v1057_v2  ;;  %v1064_v5 = vsel %vm562_vm7, %v2546_v24, 0.0 }
 0x214   : > { %v1060_v29 = vsel %vm562_vm7, %v990_v4, 0.0  ;;  %v2547_v23 = vpop.f32.mrb[30].mxu0 }
 0x215   : > { %v1061_v34 = vadd.f32 %v1060_v29, %v1059_v48  ;;  %v993_v36 = vpop.f32.mrb[31].mxu0  ;;  %v1066_v11 = vsel %vm562_vm7, %v2547_v23, 0.0 }
 0x216   : > { %v1062_v28 = vsel %vm562_vm7, %v993_v36, 0.0 }
 0x217   : > { %v1063_v32 = vadd.f32 %v1062_v28, %v1061_v34 }
 0x219   : > { %v1065_v53 = vadd.f32 %v1064_v5, %v1063_v32 }
 0x21b   : > { %v1067_v35 = vadd.f32 %v1066_v11, %v1065_v53 }
 0x21d   : > { %v1068_v12 = vrot.slane %v1067_v35, 4 }
 0x21f   : > { %v1069_v19 = vadd.f32 %v1068_v12, %v1067_v35 }
 0x221   : > { %v1070_v9 = vrot.slane %v1069_v19, 2 }
 0x223   : > { %v1071_v0 = vadd.f32 %v1070_v9, %v1069_v19 }
 0x225   : > { %v1072_v39 = vrot.slane %v1071_v0, 1 }
 0x227   : > { %v1073_v13 = vadd.f32 %v1072_v39, %v1071_v0 }
 0x229   : > { %v1074_v3 = vmul.f32 0.00390625, %v1073_v13 }
 0x22b   : > { %v3450_v10 = vsub.f32 %v3350_v45, %v1074_v3  ;;  %v3453_v61 = vsub.f32 %v3354_v18, %v1074_v3  ;;  %v3456_v38 = vsub.f32 %v3348_v62, %v1074_v3  ;;  %v3459_v60 = vsub.f32 %v3352_v21, %v1074_v3 }
 0x22c   : > { %v3462_v41 = vsub.f32 %v3366_v44, %v1074_v3  ;;  %v3465_v63 = vsub.f32 %v3372_v8, %v1074_v3  ;;  %v3468_v59 = vsub.f32 %v3364_v6, %v1074_v3  ;;  %v3471_v45 = vsub.f32 %v3370_v20, %v1074_v3 }
 0x22d   : > { %v3474_v18 = vsub.f32 %v3382_v1, %v1074_v3  ;;  %v3477_v62 = vsub.f32 %v3388_v26, %v1074_v3  ;;  %v3480_v21 = vsub.f32 %v3380_v55, %v1074_v3  ;;  %v3483_v44 = vsub.f32 %v3386_v7, %v1074_v3 }
 0x22e   : > { %v3486_v8 = vsub.f32 %v3398_v31, %v1074_v3  ;;  %v3489_v6 = vsub.f32 %v3404_v49, %v1074_v3  ;;  %v3492_v20 = vsub.f32 %v3396_v52, %v1074_v3  ;;  %v3495_v1 = vsub.f32 %v3402_v25, %v1074_v3 }
 0x22f   : > { %v3498_v26 = vsub.f32 %v3414_v57, %v1074_v3  ;;  %v3501_v55 = vsub.f32 %v3420_v37, %v1074_v3  ;;  %v3504_v7 = vsub.f32 %v3412_v17, %v1074_v3  ;;  %v3507_v31 = vsub.f32 %v3418_v50, %v1074_v3 }
 0x230   : > { %v3510_v49 = vsub.f32 %v3430_v47, %v1074_v3  ;;  %v3512_v52 = vsub.f32 %v961_v51, %v1074_v3  ;;  %v3515_v25 = vsub.f32 %v3428_v43, %v1074_v3  ;;  %v3518_v57 = vsub.f32 %v3434_v40, %v1074_v3 }
 0x231   : > { %v3520_v54 = vsub.f32 %v974_v15, %v1074_v3  ;;  %v3522_v37 = vsub.f32 %v977_v22, %v1074_v3  ;;  %v3524_v17 = vsub.f32 %v2542_v56, %v1074_v3  ;;  %v3526_v14 = vsub.f32 %v2543_v33, %v1074_v3 }
 0x232   : > { %v3528_v50 = vsub.f32 %v990_v4, %v1074_v3  ;;  %v3530_v47 = vsub.f32 %v993_v36, %v1074_v3  ;;  %v3532_v51 = vsub.f32 %v2546_v24, %v1074_v3  ;;  %v3534_v30 = vsub.f32 %v2547_v23, %v1074_v3 }
 0x233   : > { %v1107_v43 = vmul.f32 %v3450_v10, %v3450_v10  ;;  %v1108_v40 = vmul.f32 %v3453_v61, %v3453_v61  ;;  %v1109_v56 = vmul.f32 %v3456_v38, %v3456_v38  ;;  %v1110_v15 = vmul.f32 %v3459_v60, %v3459_v60 }
 0x234   : > { %v1111_v46 = vmul.f32 %v3462_v41, %v3462_v41  ;;  %v1112_v24 = vmul.f32 %v3465_v63, %v3465_v63  ;;  %v1113_v29 = vmul.f32 %v3468_v59, %v3468_v59  ;;  %v1114_v36 = vmul.f32 %v3471_v45, %v3471_v45 }
 0x235   : > { %v1139_v33 = vsel %vm562_vm7, %v1107_v43, 0.0  ;;  %v1140_v22 = vsel %vm562_vm7, %v1108_v40, 0.0  ;;  %v1142_v2 = vsel %vm562_vm7, %v1109_v56, 0.0  ;;  %v1144_v4 = vsel %vm562_vm7, %v1110_v15, 0.0 }
 0x236   : > { %v1141_v58 = vadd.f32 %v1140_v22, %v1139_v33  ;;  %v1146_v23 = vsel %vm562_vm7, %v1111_v46, 0.0  ;;  %v1148_v28 = vsel %vm562_vm7, %v1112_v24, 0.0  ;;  %v1115_v5 = vmul.f32 %v3474_v18, %v3474_v18 }
 0x237   : > { %v1150_v53 = vsel %vm562_vm7, %v1113_v29, 0.0  ;;  %v1116_v35 = vmul.f32 %v3477_v62, %v3477_v62  ;;  %v1152_v12 = vsel %vm562_vm7, %v1114_v36, 0.0  ;;  %v1117_v9 = vmul.f32 %v3480_v21, %v3480_v21 }
 0x238   : > { %v1143_v16 = vadd.f32 %v1142_v2, %v1141_v58  ;;  %v1154_v0 = vsel %vm562_vm7, %v1115_v5, 0.0  ;;  %v1118_v13 = vmul.f32 %v3483_v44, %v3483_v44  ;;  %v1119_v40 = vmul.f32 %v3486_v8, %v3486_v8 }
 0x239   : > { %v1156_v3 = vsel %vm562_vm7, %v1116_v35, 0.0  ;;  %v1158_v56 = vsel %vm562_vm7, %v1117_v9, 0.0  ;;  %v1120_v33 = vmul.f32 %v3489_v6, %v3489_v6  ;;  %v1121_v46 = vmul.f32 %v3492_v20, %v3492_v20 }
 0x23a   : > { %v1145_v48 = vadd.f32 %v1144_v4, %v1143_v16  ;;  %v1160_v22 = vsel %vm562_vm7, %v1118_v13, 0.0  ;;  %v1162_v2 = vsel %vm562_vm7, %v1119_v40, 0.0  ;;  %v1122_v24 = vmul.f32 %v3495_v1, %v3495_v1 }
 0x23b   : > { %v1164_v4 = vsel %vm562_vm7, %v1120_v33, 0.0  ;;  %v1123_v29 = vmul.f32 %v3498_v26, %v3498_v26  ;;  %v1124_v36 = vmul.f32 %v3501_v55, %v3501_v55  ;;  %v1125_v5 = vmul.f32 %v3504_v7, %v3504_v7 }
 0x23c   : > { %v1147_v34 = vadd.f32 %v1146_v23, %v1145_v48  ;;  %v1166_v23 = vsel %vm562_vm7, %v1121_v46, 0.0  ;;  %v1126_v35 = vmul.f32 %v3507_v31, %v3507_v31  ;;  %v1127_v9 = vmul.f32 %v3510_v49, %v3510_v49 }
 0x23d   : > { %v1128_v13 = vmul.f32 %v3512_v52, %v3512_v52  ;;  %v1129_v40 = vmul.f32 %v3515_v25, %v3515_v25  ;;  %v1130_v33 = vmul.f32 %v3518_v57, %v3518_v57  ;;  %v1131_v46 = vmul.f32 %v3520_v54, %v3520_v54 }
 0x23e   : > { %v1149_v32 = vadd.f32 %v1148_v28, %v1147_v34  ;;  %v1168_v28 = vsel %vm562_vm7, %v1122_v24, 0.0  ;;  %v1132_v24 = vmul.f32 %v3522_v37, %v3522_v37 }
 0x240   : > { %v1151_v11 = vadd.f32 %v1150_v53, %v1149_v32  ;;  %v1170_v53 = vsel %vm562_vm7, %v1123_v29, 0.0  ;;  %v1133_v29 = vmul.f32 %v3524_v17, %v3524_v17 }
 0x242   : > { %v1153_v19 = vadd.f32 %v1152_v12, %v1151_v11  ;;  %v1172_v12 = vsel %vm562_vm7, %v1124_v36, 0.0  ;;  %v1134_v36 = vmul.f32 %v3526_v14, %v3526_v14 }
 0x244   : > { %v1155_v39 = vadd.f32 %v1154_v0, %v1153_v19  ;;  %v1174_v0 = vsel %vm562_vm7, %v1125_v5, 0.0  ;;  %v1135_v5 = vmul.f32 %v3528_v50, %v3528_v50 }
 0x246   : > { %v1157_v43 = vadd.f32 %v1156_v3, %v1155_v39  ;;  %v1176_v3 = vsel %vm562_vm7, %v1126_v35, 0.0  ;;  %v1136_v35 = vmul.f32 %v3530_v47, %v3530_v47 }
 0x248   : > { %v1159_v15 = vadd.f32 %v1158_v56, %v1157_v43  ;;  %v1178_v56 = vsel %vm562_vm7, %v1127_v9, 0.0  ;;  %v1137_v9 = vmul.f32 %v3532_v51, %v3532_v51 }
 0x24a   : > { %v1161_v58 = vadd.f32 %v1160_v22, %v1159_v15  ;;  %v1180_v22 = vsel %vm562_vm7, %v1128_v13, 0.0  ;;  %v1138_v13 = vmul.f32 %v3534_v30, %v3534_v30 }
 0x24c   : > { %v1163_v16 = vadd.f32 %v1162_v2, %v1161_v58  ;;  %v1182_v2 = vsel %vm562_vm7, %v1129_v40, 0.0  ;;  %v1198_v40 = vsel %vm562_vm7, %v1137_v9, 0.0 }
 0x24e   : > { %v1165_v48 = vadd.f32 %v1164_v4, %v1163_v16  ;;  %v1184_v4 = vsel %vm562_vm7, %v1130_v33, 0.0 }
 0x250   : > { %v1167_v34 = vadd.f32 %v1166_v23, %v1165_v48  ;;  %v1186_v23 = vsel %vm562_vm7, %v1131_v46, 0.0 }
 0x252   : > { %v1169_v32 = vadd.f32 %v1168_v28, %v1167_v34  ;;  %v1188_v28 = vsel %vm562_vm7, %v1132_v24, 0.0 }
 0x254   : > { %v1171_v11 = vadd.f32 %v1170_v53, %v1169_v32  ;;  %v1190_v53 = vsel %vm562_vm7, %v1133_v29, 0.0 }
 0x256   : > { %v1173_v19 = vadd.f32 %v1172_v12, %v1171_v11  ;;  %v1192_v12 = vsel %vm562_vm7, %v1134_v36, 0.0 }
 0x258   : > { %v1175_v39 = vadd.f32 %v1174_v0, %v1173_v19  ;;  %v1194_v0 = vsel %vm562_vm7, %v1135_v5, 0.0 }
 0x25a   : > { %v1177_v43 = vadd.f32 %v1176_v3, %v1175_v39  ;;  %v1196_v3 = vsel %vm562_vm7, %v1136_v35, 0.0 }
 0x25c   : > { %v1179_v15 = vadd.f32 %v1178_v56, %v1177_v43 }
 0x25e   : > { %v1181_v58 = vadd.f32 %v1180_v22, %v1179_v15  ;;  %v1200_v15 = vsel %vm562_vm7, %v1138_v13, 0.0 }
 0x260   : > { %v1183_v16 = vadd.f32 %v1182_v2, %v1181_v58 }
 0x262   : > { %v1185_v48 = vadd.f32 %v1184_v4, %v1183_v16 }
 0x264   : > { %v1187_v34 = vadd.f32 %v1186_v23, %v1185_v48 }
 0x266   : > { %v1189_v32 = vadd.f32 %v1188_v28, %v1187_v34 }
 0x268   : > { %v1191_v11 = vadd.f32 %v1190_v53, %v1189_v32 }
 0x26a   : > { %v1193_v19 = vadd.f32 %v1192_v12, %v1191_v11 }
 0x26c   : > { %v1195_v39 = vadd.f32 %v1194_v0, %v1193_v19 }
 0x26e   : > { %v1197_v43 = vadd.f32 %v1196_v3, %v1195_v39 }
 0x270   : > { %v1199_v56 = vadd.f32 %v1198_v40, %v1197_v43 }
 0x272   : > { %v1201_v33 = vadd.f32 %v1200_v15, %v1199_v56 }
 0x274   : > { %v1202_v22 = vrot.slane %v1201_v33, 4 }
 0x276   : > { %v1203_v58 = vadd.f32 %v1202_v22, %v1201_v33 }
 0x278   : > { %v1204_v46 = vrot.slane %v1203_v58, 2 }
 0x27a   : > { %v1205_v2 = vadd.f32 %v1204_v46, %v1203_v58 }
 0x27c   : > { %v1206_v16 = vrot.slane %v1205_v2, 1 }
 0x27e   : > { %v1207_v24 = vadd.f32 %v1206_v16, %v1205_v2 }
 0x280   : > { %v1208_v4 = vmul.f32 0.00390625, %v1207_v24 }
 0x282   : > { %v1209_v48 = vadd.f32 1e-05, %v1208_v4 }
 0x284   : > { %2606 = vrsqrt.f32 %v1209_v48 }
 0x28e   : > { %v2607_v29 = vpop.eup %2606 }
 0x28f   : > { %v3633_v23 = vmul.f32 %v2607_v29, %v3530_v47  ;;  %v1213_v34 = vmul.f32 %v2607_v29, %v3456_v38  ;;  %v1214_v36 = vmul.f32 %v2607_v29, %v3459_v60  ;;  %v1211_v28 = vmul.f32 %v2607_v29, %v3450_v10 }
 0x290   : > { %v1212_v32 = vmul.f32 %v2607_v29, %v3453_v61  ;;  %v1215_v5 = vmul.f32 %v2607_v29, %v3462_v41  ;;  %v1216_v53 = vmul.f32 %v2607_v29, %v3465_v63  ;;  %v1217_v35 = vmul.f32 %v2607_v29, %v3468_v59 }
 0x291   : > { %v1272_v11 = vmax.f32 %v3633_v23, 0.0  ;;  %v1218_v12 = vmul.f32 %v2607_v29, %v3471_v45  ;;  %v1219_v47 = vmul.f32 %v2607_v29, %v3474_v18  ;;  %v1220_v38 = vmul.f32 %v2607_v29, %v3477_v62 }
 0x292   : > { %v1221_v60 = vmul.f32 %v2607_v29, %v3480_v21  ;;  %v1245_v19 = vmax.f32 %v1213_v34, 0.0  ;;  %v1246_v10 = vmax.f32 %v1214_v36, 0.0  ;;  %v1222_v61 = vmul.f32 %v2607_v29, %v3483_v44 }
 0x293   : > { %v1223_v41 = vmul.f32 %v2607_v29, %v3486_v8  ;;  %v1224_v63 = vmul.f32 %v2607_v29, %v3489_v6  ;;  %v3651_v9 = vmul.f32 %v2607_v29, %v3492_v20  ;;  %v3654_v59 = vmul.f32 %v2607_v29, %v3495_v1 }
 0x294   : > { %v1227_v45 = vmul.f32 %v2607_v29, %v3498_v26  ;;  %v1228_v18 = vmul.f32 %v2607_v29, %v3501_v55  ;;  %v1276_v62 = vpack.c.bf16 %v1246_v10, %v1245_v19  ;;  %v3659_v21 = vmul.f32 %v2607_v29, %v3504_v7 }
 0x295   : > { %v3662_v44 = vmul.f32 %v2607_v29, %v3507_v31  ;;  %v3665_v8 = vmul.f32 %v2607_v29, %v3510_v49  ;;  %v3668_v6 = vmul.f32 %v2607_v29, %v3512_v52  ;;  %v1243_v20 = vmax.f32 %v1211_v28, 0.0 }
 0x296   : > { %1547 = vrot.lane.b32.xlu0 %v1276_v62, %s2650_s18  ;;  %v1244_v1 = vmax.f32 %v1212_v32, 0.0  ;;  %v1247_v26 = vmax.f32 %v1215_v5, 0.0  ;;  %v1248_v0 = vmax.f32 %v1216_v53, 0.0  ;;  %v3672_v55 = vmul.f32 %v2607_v29, %v3515_v25 }
 0x297   : > { %v3675_v7 = vmul.f32 %v2607_v29, %v3518_v57  ;;  %v1251_v31 = vmax.f32 %v1219_v47, 0.0  ;;  %v1252_v39 = vmax.f32 %v1220_v38, 0.0  ;;  %v3678_v49 = vmul.f32 %v2607_v29, %v3520_v54 }
 0x298   : > { %v3681_v52 = vmul.f32 %v2607_v29, %v3522_v37  ;;  %v1249_v13 = vmax.f32 %v1217_v35, 0.0  ;;  %v1250_v3 = vmax.f32 %v1218_v12, 0.0  ;;  %v3684_v43 = vmul.f32 %v2607_v29, %v3524_v17 }
 0x299   : > { %v3687_v40 = vmul.f32 %v2607_v29, %v3526_v14  ;;  %v1255_v25 = vmax.f32 %v1223_v41, 0.0  ;;  %v1256_v56 = vmax.f32 %v1224_v63, 0.0  ;;  %v3690_v57 = vmul.f32 %v2607_v29, %v3528_v50 }
 0x29a   : > { %v3693_v15 = vmul.f32 %v2607_v29, %v3532_v51  ;;  %v1275_v54 = vpack.c.bf16 %v1244_v1, %v1243_v20  ;;  %v1277_v33 = vpack.c.bf16 %v1248_v0, %v1247_v26  ;;  %v1253_v37 = vmax.f32 %v1221_v60, 0.0 }
 0x29b   : > { %v1254_v22 = vmax.f32 %v1222_v61, 0.0  ;;  %v3695_v58 = vshll.u32 %v1276_v62, 16  ;;  %v1279_v46 = vpack.c.bf16 %v1252_v39, %v1251_v31  ;;  %v1259_v17 = vmax.f32 %v1227_v45, 0.0 }
 0x29c   : > { %v1260_v2 = vmax.f32 %v1228_v18, 0.0  ;;  %1549 = vrot.lane.b32.xlu1 %v1275_v54, %s2650_s18  ;;  %1551 = vrot.lane.b32.xlu0 %v1277_v33, %s2650_s18  ;;  %v3699_v14 = vshll.u32 %v1275_v54, 16  ;;  %v3701_v50 = vpack.c.bf16 %v1250_v3, %v1249_v13  ;;  %v1242_v51 = vmul.f32 %v2607_v29, %v3534_v30 }
 0x29d   : > { %v1257_v16 = vmax.f32 %v3651_v9, 0.0  ;;  %v3705_v24 = vshll.u32 %v1277_v33, 16  ;;  %v3707_v4 = vpack.c.bf16 %v1256_v56, %v1255_v25  ;;  %v1258_v48 = vmax.f32 %v3654_v59, 0.0 }
 0x29e   : > { %v3710_v34 = vshrl.u32 %v1275_v54, 16  ;;  %v1453_v36 = vrot.slane %v3699_v14, 1  ;;  %v1451_v28 = vrot.slane %v3695_v58, 1  ;;  %v3714_v32 = vshrl.u32 %v1277_v33, 16 }
 0x29f   : > { %v1455_v5 = vrot.slane %v3705_v24, 1  ;;  %v3717_v53 = vshll.u32 %v1279_v46, 16  ;;  %v3719_v30 = vpack.c.bf16 %v1254_v22, %v1253_v37  ;;  %v3721_v29 = vshrl.u32 %v1276_v62, 16 }
 0x2a0   : > { %v1454_v35 = vor.u32 %v1453_v36, %v3710_v34  ;;  %v3725_v12 = vshll.u32 %v3701_v50, 16  ;;  %v3727_v47 = vpack.c.bf16 %v1260_v2, %v1259_v17  ;;  %v1261_v38 = vmax.f32 %v3659_v21, 0.0 }
 0x2a1   : > { %v1263_v60 = vmax.f32 %v3665_v8, 0.0  ;;  %v1456_v19 = vor.u32 %v1455_v5, %v3714_v32  ;;  %v3733_v10 = vshll.u32 %v3707_v4, 16  ;;  %v1264_v61 = vmax.f32 %v3668_v6, 0.0 }
 0x2a2   : > { %v1516_v41 = vsel %vm2725_vm2, %v1454_v35, %v3699_v14  ;;  %v1452_v63 = vor.u32 %v1451_v28, %v3721_v29  ;;  %v3741_v9 = vshll.u32 %v3719_v30, 16  ;;  %v1262_v59 = vmax.f32 %v3662_v44, 0.0 }
 0x2a3   : > { %1597 = vrot.lane.b32.xlu1 %v1516_v41, %s2651_s19  ;;  %v1517_v45 = vsel %vm2725_vm2, %v1456_v19, %v3705_v24  ;;  %v1459_v18 = vrot.slane %v3717_v53, 1  ;;  %v3749_v62 = vpack.c.bf16 %v1258_v48, %v1257_v16  ;;  %v1267_v21 = vmax.f32 %v3678_v49, 0.0 }
 0x2a4   : > { %v1268_v8 = vmax.f32 %v3681_v52, 0.0  ;;  %1599 = vrot.lane.b32.xlu0 %v1517_v45, %s2651_s19  ;;  %v1457_v6 = vrot.slane %v3725_v12, 1  ;;  %v3756_v44 = vshll.u32 %v3727_v47, 16  ;;  %v1273_v20 = vmax.f32 %v3693_v15, 0.0 }
 0x2a5   : > { %v3759_v1 = vshrl.u32 %v1279_v46, 16  ;;  %v1463_v26 = vrot.slane %v3733_v10, 1  ;;  %v1461_v0 = vrot.slane %v3741_v9, 1  ;;  %v1515_v31 = vsel %vm2725_vm2, %v1452_v63, %v3695_v58 }
 0x2a6   : > { %v3767_v39 = vshrl.u32 %v3701_v50, 16  ;;  %v3770_v49 = vshll.u32 %v3749_v62, 16  ;;  %v3772_v52 = vpack.c.bf16 %v1264_v61, %v1263_v60  ;;  %v1274_v13 = vmax.f32 %v1242_v51, 0.0 }
 0x2a7   : > { %1595 = vrot.lane.b32.xlu1 %v1515_v31, %s2651_s19  ;;  %v1460_v3 = vor.u32 %v1459_v18, %v3759_v1  ;;  %v3777_v25 = vshrl.u32 %v3707_v4, 16  ;;  %v3780_v56 = vshrl.u32 %v3719_v30, 16  ;;  %v1265_v15 = vmax.f32 %v3672_v55, 0.0 }
 0x2a8   : > { %v1266_v54 = vmax.f32 %v3675_v7, 0.0  ;;  %1555 = vrot.lane.b32.xlu0 %v1279_v46, %s2650_s18  ;;  %v1458_v33 = vor.u32 %v1457_v6, %v3767_v39  ;;  %v1467_v37 = vrot.slane %v3756_v44, 1  ;;  %v1269_v22 = vmax.f32 %v3684_v43, 0.0 }
 0x2a9   : > { %v1464_v17 = vor.u32 %v1463_v26, %v3777_v25  ;;  %v1462_v2 = vor.u32 %v1461_v0, %v3780_v56  ;;  %v3790_v51 = vpack.c.bf16 %v1262_v59, %v1261_v38  ;;  %v1271_v16 = vmax.f32 %v3690_v57, 0.0 }
 0x2aa   : > { %v3794_v55 = vshrl.u32 %v3727_v47, 16  ;;  %v1465_v7 = vrot.slane %v3770_v49, 1  ;;  %v3798_v46 = vshll.u32 %v3772_v52, 16  ;;  %v1270_v48 = vmax.f32 %v3687_v40, 0.0 }
 0x2ab   : > { %v3801_v36 = vpack.c.bf16 %v1274_v13, %v1273_v20  ;;  %1553 = vrot.lane.b32.xlu1 %v3701_v50, %s2650_s18  ;;  %v1519_v43 = vsel %vm2725_vm2, %v1460_v3, %v3717_v53  ;;  %v3808_v57 = vpack.c.bf16 %v1268_v8, %v1267_v21  ;;  %v1518_v28 = vsel %vm2725_vm2, %v1458_v33, %v3725_v12 }
 0x2ac   : > { %1603 = vrot.lane.b32.xlu0 %v1519_v43, %s2651_s19  ;;  %v3815_v5 = vshrl.u32 %v3749_v62, 16  ;;  %v3818_v40 = vor.u32 %v1467_v37, %v3794_v55  ;;  %v3820_v35 = vpack.c.bf16 %v1266_v54, %v1265_v15  ;;  %v1521_v50 = vsel %vm2725_vm2, %v1464_v17, %v3733_v10 }
 0x2ad   : > { %v1520_v38 = vsel %vm2725_vm2, %v1462_v2, %v3741_v9  ;;  %v3829_v60 = vshrl.u32 %v3772_v52, 16  ;;  %v3832_v19 = vshrl.u32 %v3790_v51, 16  ;;  %v1471_v41 = vrot.slane %v3798_v46, 1 }
 0x2ae   : > { %v3835_v61 = vor.u32 %v1465_v7, %v3815_v5  ;;  %v3839_v63 = vshll.u32 %v3790_v51, 16  ;;  %v3843_v59 = vpack.c.bf16 %v1272_v11, %v1271_v16  ;;  %v3847_v45 = vshrl.u32 %v3808_v57, 16 }
 0x2af   : > { %1601 = vrot.lane.b32.xlu1 %v1518_v28, %s2651_s19  ;;  %v3849_v18 = vpack.c.bf16 %v1270_v48, %v1269_v22  ;;  %v1355_v21 = vrot.slane %v3721_v29, 7  ;;  %v1359_v8 = vrot.slane %v3710_v34, 7  ;;  %v1523_v23 = vsel %vm2725_vm2, %v3818_v40, %v3756_v44 }
 0x2b0   : > { %1559 = vrot.lane.b32.xlu0 %v3707_v4, %s2650_s18  ;;  %v3860_v11 = vshrl.u32 %v3820_v35, 16  ;;  %v3863_v6 = vshll.u32 %v3808_v57, 16  ;;  %v1363_v20 = vrot.slane %v3714_v32, 7  ;;  %v3867_v26 = vshll.u32 %v3820_v35, 16 }
 0x2b1   : > { %v3870_v0 = vshrl.u32 %v3801_v36, 16  ;;  %v3873_v4 = vor.u32 %v3695_v58, %v1355_v21  ;;  %v3876_v31 = vor.u32 %v3699_v14, %v1359_v8  ;;  %v3879_v13 = vshrl.u32 %v3843_v59, 16 }
 0x2b2   : > { %v3882_v3 = vor.u32 %v3705_v24, %v1363_v20  ;;  %v1371_v15 = vrot.slane %v3759_v1, 7  ;;  %v1367_v54 = vrot.slane %v3767_v39, 7  ;;  %v3889_v33 = vshrl.u32 %v3849_v18, 16 }
 0x2b3   : > { %1557 = vrot.lane.b32.xlu1 %v3719_v30, %s2650_s18  ;;  %v3892_v58 = vshll.u32 %v3843_v59, 16  ;;  %v1435_v14 = vsel %vm2861_vm5, %v3721_v29, %v3873_v4  ;;  %v1436_v24 = vsel %vm2861_vm5, %v3710_v34, %v3876_v31  ;;  %v3904_v30 = vshll.u32 %v3849_v18, 16 }
 0x2b4   : > { %1607 = vrot.lane.b32.xlu0 %v1521_v50, %s2651_s19  ;;  %v1437_v37 = vsel %vm2861_vm5, %v3714_v32, %v3882_v3  ;;  %v3911_v22 = vor.u32 %v3717_v53, %v1371_v15  ;;  %v3914_v17 = vor.u32 %v3725_v12, %v1367_v54  ;;  %v3917_v2 = vshll.u32 %v3801_v36, 16 }
 0x2b5   : > { %v1379_v16 = vrot.slane %v3777_v25, 7  ;;  %v1375_v7 = vrot.slane %v3780_v56, 7  ;;  %v1387_v48 = vrot.slane %v3794_v55, 7  ;;  %v1383_v12 = vrot.slane %v3815_v5, 7 }
 0x2b6   : > { %v1439_v43 = vsel %vm2861_vm5, %v3759_v1, %v3911_v22  ;;  %v1438_v53 = vsel %vm2861_vm5, %v3767_v39, %v3914_v17  ;;  %v1395_v28 = vrot.slane %v3829_v60, 7  ;;  %v1391_v8 = vrot.slane %v3832_v19, 7 }
 0x2b7   : > { %1605 = vrot.lane.b32.xlu1 %v1520_v38, %s2651_s19  ;;  %v3934_v40 = vor.u32 %v3733_v10, %v1379_v16  ;;  %v3937_v50 = vor.u32 %v3741_v9, %v1375_v7  ;;  %v3940_v21 = vor.u32 %v3756_v44, %v1387_v48  ;;  %v3946_v20 = vor.u32 %v3770_v49, %v1383_v12 }
 0x2b8   : > { %1563 = vrot.lane.b32.xlu0 %v3727_v47, %s2650_s18  ;;  %v3949_v15 = vor.u32 %v3798_v46, %v1395_v28  ;;  %v1403_v10 = vrot.slane %v3847_v45, 7  ;;  %v1399_v38 = vrot.slane %v3860_v11, 7  ;;  %v3966_v54 = vor.u32 %v3839_v63, %v1391_v8 }
 0x2b9   : > { %v1441_v9 = vsel %vm2861_vm5, %v3777_v25, %v3934_v40  ;;  %v1440_v47 = vsel %vm2861_vm5, %v3780_v56, %v3937_v50  ;;  %v1411_v8 = vrot.slane %v3879_v13, 7  ;;  %v1407_v44 = vrot.slane %v3889_v33, 7 }
 0x2ba   : > { %v3977_v48 = vor.u32 %v3863_v6, %v1403_v10  ;;  %v3980_v12 = vor.u32 %v3867_v26, %v1399_v38  ;;  %v1415_v7 = vrot.slane %v3870_v0, 7  ;;  %v1469_v10 = vrot.slane %v3839_v63, 1 }
 0x2bb   : > { %1561 = vrot.lane.b32.xlu1 %v3749_v62, %s2650_s18  ;;  %v4001_v38 = vor.u32 %v3892_v58, %v1411_v8  ;;  %v4004_v28 = vor.u32 %v3904_v30, %v1407_v44  ;;  %v1472_v8 = vor.u32 %v1471_v41, %v3829_v60  ;;  %v1473_v44 = vrot.slane %v3867_v26, 1 }
 0x2bc   : > { %1611 = vrot.lane.b32.xlu0 %v1523_v23, %s2651_s19  ;;  %v1446_v62 = vsel %vm2861_vm5, %v3860_v11, %v3980_v12  ;;  %v4007_v16 = vor.u32 %v3917_v2, %v1415_v7  ;;  %v1522_v23 = vsel %vm2725_vm2, %v3835_v61, %v3770_v49  ;;  %v1470_v61 = vor.u32 %v1469_v10, %v3832_v19 }
 0x2bd   : > { %v1448_v7 = vsel %vm2861_vm5, %v3889_v33, %v4004_v28  ;;  %v1525_v41 = vsel %vm2725_vm2, %v1472_v8, %v3798_v46  ;;  %v1477_v8 = vrot.slane %v3904_v30, 1 }
 0x2be   : > { %v1524_v49 = vsel %vm2725_vm2, %v1470_v61, %v3839_v63  ;;  %v1479_v63 = vrot.slane %v3892_v58, 1  ;;  %v2604_v61 = vld [vmem:[%s4820_s2 + $0x8] sm:$0xff]  }
 0x2bf   : > { %1609 = vrot.lane.b32.xlu1 %v1522_v23, %s2651_s19  ;;  %v1475_v23 = vrot.slane %v3863_v6, 1 }
 0x2c0   : > { %1567 = vrot.lane.b32.xlu0 %v3772_v52, %s2650_s18 }
 0x2c1   : > { %v1476_v52 = vor.u32 %v1475_v23, %v3847_v45 }
 0x2c3   : > { %1565 = vrot.lane.b32.xlu1 %v3790_v51, %s2650_s18  ;;  %v1474_v51 = vor.u32 %v1473_v44, %v3860_v11  ;;  %v1527_v46 = vsel %vm2725_vm2, %v1476_v52, %v3863_v6  ;;  %v1478_v6 = vor.u32 %v1477_v8, %v3889_v33 }
 0x2c4   : > { %1615 = vrot.lane.b32.xlu0 %v1525_v41, %s2651_s19 }
 0x2c5   : > { %v1526_v10 = vsel %vm2725_vm2, %v1474_v51, %v3867_v26 }
 0x2c7   : > { %1613 = vrot.lane.b32.xlu1 %v1524_v49, %s2651_s19  ;;  %v2603_v49 = vld [vmem:[%s4820_s2] sm:$0xff]  }
 0x2c8   : > { %1571 = vrot.lane.b32.xlu0 %v3808_v57, %s2650_s18  ;;  %v1480_v57 = vor.u32 %v1479_v63, %v3879_v13  ;;  %2548 = vmatprep.subr.bf16.mxu1 %v2603_v49 }
 0x2c9   : > { %2549 = vmatpush3.bf16.msra.mxu1 %v2603_v49 }
 0x2ca   : > { %v1529_v26 = vsel %vm2725_vm2, %v1480_v57, %v3892_v58  ;;  %2550 = vmatprep.subr.bf16.mxu1 %v2604_v61 }
 0x2cb   : > { %1569 = vrot.lane.b32.xlu1 %v3820_v35, %s2650_s18  ;;  %v1481_v35 = vrot.slane %v3917_v2, 1 }
 0x2cc   : > { %1619 = vrot.lane.b32.xlu0 %v1527_v46, %s2651_s19 }
 0x2cd   : > { %v1482_v44 = vor.u32 %v1481_v35, %v3870_v0  ;;  %2551 = vmatpush3.bf16.msra.mxu1 %v2604_v61 }
 0x2cf   : > { %1617 = vrot.lane.b32.xlu1 %v1526_v10, %s2651_s19 }
 0x2d0   : > { %1575 = vrot.lane.b32.xlu0 %v3843_v59, %s2650_s18  ;;  %v1528_v59 = vsel %vm2725_vm2, %v1478_v6, %v3904_v30  ;;  %v2605_v30 = vld [vmem:[%s4820_s2 + $0x10] ss:$0 sps:$4 sm:$0x33]   ;;  %v4829_v6 = vsel %vm2861_vm5, %v3815_v5, %v3946_v20 }
 0x2d1   : > { %2587 = vmatprep.subr.msk.bf16.mxu1 %vm840_vm6, %v2605_v30  ;;  %v1901_v27 = vsel %vm840_vm6, %v2605_v30, 0  ;;  %v4832_v30 = vsel %vm2861_vm5, %v3829_v60, %v3949_v15 }
 0x2d2   : > { %2553 = vmatpush3.bf16.msra.mxu1 %v1901_v27 }
 0x2d3   : > { %1573 = vrot.lane.b32.xlu1 %v3849_v18, %s2650_s18  ;;  %v1530_v18 = vsel %vm2725_vm2, %v1482_v44, %v3917_v2  ;;  %v4830_v44 = vsel %vm2861_vm5, %v3794_v55, %v3940_v21 }
 0x2d4   : > { %1623 = vrot.lane.b32.xlu0 %v1529_v26, %s2651_s19 }
 0x2d7   : > { %1621 = vrot.lane.b32.xlu1 %v1528_v59, %s2651_s19 }
 0x2d8   : > { %1625 = vrot.lane.b32.xlu0 %v1530_v18, %s2651_s19  ;;  %v4831_v18 = vsel %vm2861_vm5, %v3832_v19, %v3966_v54 }
 0x2db   : > { %1577 = vrot.lane.b32.xlu1 %v3801_v36, %s2650_s18 }
 0x308   : > { %v1548_v58 = vpop.permute.xlu0 %1547 }
 0x309   : > { %v1629_v46 = vsel %vm562_vm7, %v1435_v14, %v1548_v58 }
 0x30e   : > { %v1552_v41 = vpop.permute.xlu0 %1551  ;;  %v1550_v2 = vpop.permute.xlu1 %1549 }
 0x30f   : > { %v1632_v36 = vsel %vm562_vm7, %v1436_v24, %v1550_v2  ;;  %v1635_v29 = vsel %vm562_vm7, %v1437_v37, %v1552_v41 }
 0x315   : > { %v1598_v23 = vpop.permute.xlu1 %1597 }
 0x316   : > { %v1600_v52 = vpop.permute.xlu0 %1599  ;;  %v4101_v51 = vsel %vm611_vm8, %v1632_v36, %v1598_v23  ;;  %v4833_v36 = vsel %vm2861_vm5, %v3847_v45, %v3977_v48 }
 0x317   : > { %1723 = vrot.lane.b32.xlu1 %v4101_v51, %s2652_s26  ;;  %v4125_v14 = vsel %vm611_vm8, %v1635_v29, %v1600_v52 }
 0x319   : > { %v1596_v63 = vpop.permute.xlu1 %1595 }
 0x31a   : > { %v4112_v34 = vsel %vm611_vm8, %v1629_v46, %v1596_v63  ;;  %v1556_v31 = vpop.permute.xlu0 %1555  ;;  %v4834_v63 = vsel %vm2861_vm5, %v3879_v13, %v4001_v38 }
 0x31b   : > { %1725 = vrot.lane.b32.xlu0 %v4112_v34, %s2652_s26  ;;  %1755 = vrot.lane.b32.xlu1 %v4112_v34, %s2653_s27  ;;  %v1641_v39 = vsel %vm562_vm7, %v1439_v43, %v1556_v31  ;;  %v4835_v31 = vsel %vm2861_vm5, %v3870_v0, %v4007_v16 }
 0x31d   : > { %v1554_v4 = vpop.permute.xlu1 %1553 }
 0x31e   : > { %v1604_v24 = vpop.permute.xlu0 %1603  ;;  %v1638_v32 = vsel %vm562_vm7, %v1438_v53, %v1554_v4 }
 0x31f   : > { %1757 = vrot.lane.b32.xlu0 %v4125_v14, %s2653_s27  ;;  %1727 = vrot.lane.b32.xlu1 %v4125_v14, %s2652_s26  ;;  %v4151_v53 = vsel %vm611_vm8, %v1641_v39, %v1604_v24 }
 0x321   : > { %v1602_v3 = vpop.permute.xlu1 %1601 }
 0x322   : > { %v4138_v37 = vsel %vm611_vm8, %v1638_v32, %v1602_v3  ;;  %v1560_v10 = vpop.permute.xlu0 %1559 }
 0x323   : > { %1729 = vrot.lane.b32.xlu0 %v4138_v37, %s2652_s26  ;;  %1759 = vrot.lane.b32.xlu1 %v4138_v37, %s2653_s27  ;;  %v1647_v56 = vsel %vm562_vm7, %v1441_v9, %v1560_v10 }
 0x325   : > { %v1558_v17 = vpop.permute.xlu1 %1557 }
 0x326   : > { %v1608_v8 = vpop.permute.xlu0 %1607  ;;  %v1644_v1 = vsel %vm562_vm7, %v1440_v47, %v1558_v17 }
 0x327   : > { %1761 = vrot.lane.b32.xlu0 %v4151_v53, %s2653_s27  ;;  %1731 = vrot.lane.b32.xlu1 %v4151_v53, %s2652_s26  ;;  %v4177_v47 = vsel %vm611_vm8, %v1647_v56, %v1608_v8 }
 0x329   : > { %v1606_v22 = vpop.permute.xlu1 %1605 }
 0x32a   : > { %v4164_v43 = vsel %vm611_vm8, %v1644_v1, %v1606_v22  ;;  %v1564_v57 = vpop.permute.xlu0 %1563 }
 0x32b   : > { %1733 = vrot.lane.b32.xlu0 %v4164_v43, %s2652_s26  ;;  %1763 = vrot.lane.b32.xlu1 %v4164_v43, %s2653_s27  ;;  %v1653_v5 = vsel %vm562_vm7, %v4830_v44, %v1564_v57 }
 0x32d   : > { %v1562_v50 = vpop.permute.xlu1 %1561 }
 0x32e   : > { %v1612_v35 = vpop.permute.xlu0 %1611  ;;  %v1650_v25 = vsel %vm562_vm7, %v4829_v6, %v1562_v50 }
 0x32f   : > { %1765 = vrot.lane.b32.xlu0 %v4177_v47, %s2653_s27  ;;  %1735 = vrot.lane.b32.xlu1 %v4177_v47, %s2652_s26  ;;  %v4203_v49 = vsel %vm611_vm8, %v1653_v5, %v1612_v35 }
 0x331   : > { %v1610_v40 = vpop.permute.xlu1 %1609 }
 0x332   : > { %v4190_v9 = vsel %vm611_vm8, %v1650_v25, %v1610_v40  ;;  %v1568_v26 = vpop.permute.xlu0 %1567 }
 0x333   : > { %1737 = vrot.lane.b32.xlu0 %v4190_v9, %s2652_s26  ;;  %1767 = vrot.lane.b32.xlu1 %v4190_v9, %s2653_s27  ;;  %v1659_v19 = vsel %vm562_vm7, %v4832_v30, %v1568_v26 }
 0x335   : > { %v1566_v20 = vpop.permute.xlu1 %1565 }
 0x336   : > { %v1616_v59 = vpop.permute.xlu0 %1615  ;;  %v1656_v55 = vsel %vm562_vm7, %v4831_v18, %v1566_v20 }
 0x337   : > { %1769 = vrot.lane.b32.xlu0 %v4203_v49, %s2653_s27  ;;  %1739 = vrot.lane.b32.xlu1 %v4203_v49, %s2652_s26  ;;  %v4229_v41 = vsel %vm611_vm8, %v1659_v19, %v1616_v59 }
 0x339   : > { %v1614_v21 = vpop.permute.xlu1 %1613 }
 0x33a   : > { %v4216_v58 = vsel %vm611_vm8, %v1656_v55, %v1614_v21  ;;  %v1572_v61 = vpop.permute.xlu0 %1571 }
 0x33b   : > { %1741 = vrot.lane.b32.xlu0 %v4216_v58, %s2652_s26  ;;  %1771 = vrot.lane.b32.xlu1 %v4216_v58, %s2653_s27  ;;  %v1665_v23 = vsel %vm562_vm7, %v4833_v36, %v1572_v61 }
 0x33d   : > { %v1570_v54 = vpop.permute.xlu1 %1569 }
 0x33e   : > { %v1620_v27 = vpop.permute.xlu0 %1619  ;;  %v1662_v60 = vsel %vm562_vm7, %v1446_v62, %v1570_v54 }
 0x33f   : > { %1773 = vrot.lane.b32.xlu0 %v4229_v41, %s2653_s27  ;;  %1743 = vrot.lane.b32.xlu1 %v4229_v41, %s2652_s26  ;;  %v4255_v62 = vsel %vm611_vm8, %v1665_v23, %v1620_v27 }
 0x341   : > { %v1618_v15 = vpop.permute.xlu1 %1617 }
 0x342   : > { %v4242_v2 = vsel %vm611_vm8, %v1662_v60, %v1618_v15  ;;  %v1576_v11 = vpop.permute.xlu0 %1575 }
 0x343   : > { %1745 = vrot.lane.b32.xlu0 %v4242_v2, %s2652_s26  ;;  %1775 = vrot.lane.b32.xlu1 %v4242_v2, %s2653_s27  ;;  %v1671_v33 = vsel %vm562_vm7, %v4834_v63, %v1576_v11 }
 0x345   : > { %v1574_v12 = vpop.permute.xlu1 %1573 }
 0x346   : > { %v1668_v45 = vsel %vm562_vm7, %v1448_v7, %v1574_v12  ;;  %v1624_v46 = vpop.permute.xlu0 %1623 }
 0x347   : > { %1777 = vrot.lane.b32.xlu0 %v4255_v62, %s2653_s27  ;;  %1747 = vrot.lane.b32.xlu1 %v4255_v62, %s2652_s26  ;;  %v4281_v7 = vsel %vm611_vm8, %v1671_v33, %v1624_v46 }
 0x349   : > { %v1622_v48 = vpop.permute.xlu1 %1621 }
 0x34a   : > { %v4268_v52 = vsel %vm611_vm8, %v1668_v45, %v1622_v48  ;;  %v1626_v13 = vpop.permute.xlu0 %1625 }
 0x34b   : > { %1749 = vrot.lane.b32.xlu0 %v4268_v52, %s2652_s26  ;;  %1779 = vrot.lane.b32.xlu1 %v4268_v52, %s2653_s27 }
 0x34d   : > { %v1578_v28 = vpop.permute.xlu1 %1577 }
 0x34e   : > { %v1674_v29 = vsel %vm562_vm7, %v4835_v31, %v1578_v28 }
 0x34f   : > { %1781 = vrot.lane.b32.xlu0 %v4281_v7, %s2653_s27  ;;  %1751 = vrot.lane.b32.xlu1 %v4281_v7, %s2652_s26  ;;  %v1706_v38 = vsel %vm611_vm8, %v1674_v29, %v1626_v13 }
 0x353   : > { %1753 = vrot.lane.b32.xlu0 %v1706_v38, %s2652_s26  ;;  %1783 = vrot.lane.b32.xlu1 %v1706_v38, %s2653_s27 }
 0x389   : > { %v1724_v4 = vpop.permute.xlu1 %1723 }
 0x38a   : > { %v1786_v42 = vsel %vm722_vm9, %v4112_v34, %v1724_v4 }
 0x38d   : > { %v1726_v0 = vpop.permute.xlu0 %1725  ;;  %v1756_v16 = vpop.permute.xlu1 %1755 }
 0x38e   : > { %v1818_v24 = vsel %vm755_vm10, %v1786_v42, %v1756_v16  ;;  %v1788_v32 = vsel %vm722_vm9, %v4101_v51, %v1726_v0 }
 0x38f   : > { %2554 = vmatprep.mubr.msk.bf16.mxu1 %vm807_vm11, %v1818_v24 }
 0x391   : > { %v1758_v3 = vpop.permute.xlu0 %1757  ;;  %v1728_v10 = vpop.permute.xlu1 %1727 }
 0x392   : > { %v1820_v39 = vsel %vm755_vm10, %v1788_v32, %v1758_v3  ;;  %v1790_v17 = vsel %vm722_vm9, %v4112_v34, %v1728_v10 }
 0x393   : > { %2555 = vmatmul.mubr.msk.bf16.vlgmr.msra.gmra.mrb[0].mxu1 %vm807_vm11, %v1820_v39 }
 0x395   : > { %v1730_v8 = vpop.permute.xlu0 %1729  ;;  %v1760_v1 = vpop.permute.xlu1 %1759 }
 0x396   : > { %v1822_v22 = vsel %vm755_vm10, %v1790_v17, %v1760_v1  ;;  %v1792_v57 = vsel %vm722_vm9, %v4125_v14, %v1730_v8 }
 0x397   : > { %2558 = vmatprep.mubr.msk.bf16.mxu1 %vm807_vm11, %v1822_v22 }
 0x399   : > { %v1762_v56 = vpop.permute.xlu0 %1761  ;;  %v1732_v51 = vpop.permute.xlu1 %1731 }
 0x39a   : > { %v1824_v50 = vsel %vm755_vm10, %v1792_v57, %v1762_v56  ;;  %v1794_v35 = vsel %vm722_vm9, %v4138_v37, %v1732_v51 }
 0x39b   : > { %2559 = vmatmul.mubr.msk.bf16.gmra.mrb[4].mxu1 %vm807_vm11, %v1824_v50 }
 0x39d   : > { %v1734_v6 = vpop.permute.xlu0 %1733  ;;  %v1764_v34 = vpop.permute.xlu1 %1763 }
 0x39e   : > { %v1826_v25 = vsel %vm755_vm10, %v1794_v35, %v1764_v34  ;;  %v1796_v40 = vsel %vm722_vm9, %v4151_v53, %v1734_v6 }
 0x39f   : > { %2562 = vmatprep.mubr.msk.bf16.mxu1 %vm807_vm11, %v1826_v25 }
 0x3a1   : > { %v1766_v26 = vpop.permute.xlu0 %1765  ;;  %v1736_v14 = vpop.permute.xlu1 %1735 }
 0x3a2   : > { %v1828_v44 = vsel %vm755_vm10, %v1796_v40, %v1766_v26  ;;  %v1798_v5 = vsel %vm722_vm9, %v4164_v43, %v1736_v14 }
 0x3a3   : > { %2563 = vmatmul.mubr.msk.bf16.gmra.mrb[8].mxu1 %vm807_vm11, %v1828_v44 }
 0x3a5   : > { %v1738_v20 = vpop.permute.xlu0 %1737  ;;  %v1768_v37 = vpop.permute.xlu1 %1767 }
 0x3a6   : > { %v1830_v59 = vsel %vm755_vm10, %v1798_v5, %v1768_v37  ;;  %v1800_v18 = vsel %vm722_vm9, %v4177_v47, %v1738_v20 }
 0x3a7   : > { %2566 = vmatprep.mubr.msk.bf16.mxu1 %vm807_vm11, %v1830_v59 }
 0x3a9   : > { %v1770_v55 = vpop.permute.xlu0 %1769  ;;  %v1740_v53 = vpop.permute.xlu1 %1739 }
 0x3aa   : > { %v1832_v21 = vsel %vm755_vm10, %v1800_v18, %v1770_v55  ;;  %v1802_v61 = vsel %vm722_vm9, %v4190_v9, %v1740_v53 }
 0x3ab   : > { %2567 = vmatmul.mubr.msk.bf16.gmra.mrb[12].mxu1 %vm807_vm11, %v1832_v21 }
 0x3ad   : > { %v1742_v30 = vpop.permute.xlu0 %1741  ;;  %v1772_v43 = vpop.permute.xlu1 %1771 }
 0x3ae   : > { %v1834_v19 = vsel %vm755_vm10, %v1802_v61, %v1772_v43  ;;  %v1804_v54 = vsel %vm722_vm9, %v4203_v49, %v1742_v30 }
 0x3af   : > { %2570 = vmatprep.mubr.msk.bf16.mxu1 %vm807_vm11, %v1834_v19 }
 0x3b1   : > { %v1774_v27 = vpop.permute.xlu0 %1773  ;;  %v1744_v47 = vpop.permute.xlu1 %1743 }
 0x3b2   : > { %v1836_v60 = vsel %vm755_vm10, %v1804_v54, %v1774_v27  ;;  %v1806_v15 = vsel %vm722_vm9, %v4216_v58, %v1744_v47 }
 0x3b3   : > { %2571 = vmatmul.mubr.msk.bf16.gmra.mrb[16].mxu1 %vm807_vm11, %v1836_v60 }
 0x3b5   : > { %v1746_v36 = vpop.permute.xlu0 %1745  ;;  %v1776_v9 = vpop.permute.xlu1 %1775 }
 0x3b6   : > { %v1838_v23 = vsel %vm755_vm10, %v1806_v15, %v1776_v9  ;;  %v1808_v11 = vsel %vm722_vm9, %v4229_v41, %v1746_v36 }
 0x3b7   : > { %2574 = vmatprep.mubr.msk.bf16.mxu1 %vm807_vm11, %v1838_v23 }
 0x3b9   : > { %v1778_v12 = vpop.permute.xlu0 %1777  ;;  %v1748_v49 = vpop.permute.xlu1 %1747 }
 0x3ba   : > { %v1840_v45 = vsel %vm755_vm10, %v1808_v11, %v1778_v12  ;;  %v1810_v48 = vsel %vm722_vm9, %v4242_v2, %v1748_v49 }
 0x3bb   : > { %2575 = vmatmul.mubr.msk.bf16.gmra.mrb[20].mxu1 %vm807_vm11, %v1840_v45 }
 0x3bd   : > { %v1750_v46 = vpop.permute.xlu0 %1749  ;;  %v1780_v58 = vpop.permute.xlu1 %1779 }
 0x3be   : > { %v1842_v63 = vsel %vm755_vm10, %v1810_v48, %v1780_v58  ;;  %v1812_v33 = vsel %vm722_vm9, %v4255_v62, %v1750_v46 }
 0x3bf   : > { %2578 = vmatprep.mubr.msk.bf16.mxu1 %vm807_vm11, %v1842_v63 }
 0x3c1   : > { %v1782_v28 = vpop.permute.xlu0 %1781  ;;  %v1752_v41 = vpop.permute.xlu1 %1751 }
 0x3c2   : > { %v1844_v31 = vsel %vm755_vm10, %v1812_v33, %v1782_v28  ;;  %v1814_v29 = vsel %vm722_vm9, %v4268_v52, %v1752_v41 }
 0x3c3   : > { %2579 = vmatmul.mubr.msk.bf16.gmra.mrb[24].mxu1 %vm807_vm11, %v1844_v31 }
 0x3c5   : > { %v1754_v13 = vpop.permute.xlu0 %1753  ;;  %v1784_v2 = vpop.permute.xlu1 %1783 }
 0x3c6   : > { %v1846_v38 = vsel %vm755_vm10, %v1814_v29, %v1784_v2  ;;  %v1816_v4 = vsel %vm722_vm9, %v4281_v7, %v1754_v13 }
 0x3c7   : > { %2582 = vmatprep.mubr.msk.bf16.mxu1 %vm807_vm11, %v1846_v38  ;;  %v1847_v62 = vsel %vm755_vm10, %v1816_v4, %v1782_v28 }
 0x3cb   : > { %2583 = vmatmul.mubr.msk.bf16.gmra.mrb[28].mxu1 %vm807_vm11, %v1847_v62 }
 0x466   : > { %v4360_v42 = vpop.f32.mrb[0].mxu1 }
 0x467   : > { %v4362_v0 = vpop.f32.mrb[1].mxu1  ;;  %v2067_v3 = vsel %vm562_vm7, %v4360_v42, 0.0 }
 0x468   : > { %v4364_v16 = vpop.f32.mrb[2].mxu1  ;;  %v2064_v24 = vsel %vm562_vm7, %v4362_v0, 0.0 }
 0x469   : > { %v4366_v52 = vpop.f32.mrb[3].mxu1  ;;  %v2069_v39 = vsel %vm562_vm7, %v4364_v16, 0.0 }
 0x46a   : > { %v2065_v7 = vsel %vm562_vm7, %v4366_v52, 0.0 }
 0x46b   : > { %v2066_v32 = vadd.f32 %v2065_v7, %v2064_v24 }
 0x46d   : > { %v2068_v10 = vadd.f32 %v2067_v3, %v2066_v32 }
 0x46e   : > { %v4376_v17 = vpop.f32.mrb[4].mxu1 }
 0x46f   : > { %v4378_v8 = vpop.f32.mrb[5].mxu1  ;;  %v2070_v1 = vadd.f32 %v2069_v39, %v2068_v10  ;;  %v2075_v6 = vsel %vm562_vm7, %v4376_v17, 0.0 }
 0x470   : > { %v2071_v22 = vsel %vm562_vm7, %v4378_v8, 0.0  ;;  %v4382_v57 = vpop.f32.mrb[6].mxu1 }
 0x471   : > { %v2072_v56 = vadd.f32 %v2071_v22, %v2070_v1  ;;  %v4384_v51 = vpop.f32.mrb[7].mxu1  ;;  %v2077_v25 = vsel %vm562_vm7, %v4382_v57, 0.0 }
 0x472   : > { %v2073_v50 = vsel %vm562_vm7, %v4384_v51, 0.0 }
 0x473   : > { %v2074_v35 = vadd.f32 %v2073_v50, %v2072_v56 }
 0x475   : > { %v2076_v34 = vadd.f32 %v2075_v6, %v2074_v35 }
 0x476   : > { %v4392_v40 = vpop.f32.mrb[8].mxu1 }
 0x477   : > { %v4394_v26 = vpop.f32.mrb[9].mxu1  ;;  %v2078_v14 = vadd.f32 %v2077_v25, %v2076_v34  ;;  %v2083_v55 = vsel %vm562_vm7, %v4392_v40, 0.0 }
 0x478   : > { %v2079_v44 = vsel %vm562_vm7, %v4394_v26, 0.0  ;;  %v4398_v5 = vpop.f32.mrb[10].mxu1 }
 0x479   : > { %v2080_v20 = vadd.f32 %v2079_v44, %v2078_v14  ;;  %v4400_v37 = vpop.f32.mrb[11].mxu1  ;;  %v2085_v21 = vsel %vm562_vm7, %v4398_v5, 0.0 }
 0x47a   : > { %v2081_v59 = vsel %vm562_vm7, %v4400_v37, 0.0 }
 0x47b   : > { %v2082_v18 = vadd.f32 %v2081_v59, %v2080_v20 }
 0x47d   : > { %v2084_v53 = vadd.f32 %v2083_v55, %v2082_v18 }
 0x47e   : > { %v4408_v61 = vpop.f32.mrb[12].mxu1 }
 0x47f   : > { %v4410_v30 = vpop.f32.mrb[13].mxu1  ;;  %v2086_v43 = vadd.f32 %v2085_v21, %v2084_v53  ;;  %v2091_v36 = vsel %vm562_vm7, %v4408_v61, 0.0 }
 0x480   : > { %v2087_v19 = vsel %vm562_vm7, %v4410_v30, 0.0  ;;  %v4414_v54 = vpop.f32.mrb[14].mxu1 }
 0x481   : > { %v2088_v27 = vadd.f32 %v2087_v19, %v2086_v43  ;;  %v4416_v47 = vpop.f32.mrb[15].mxu1  ;;  %v2093_v23 = vsel %vm562_vm7, %v4414_v54, 0.0 }
 0x482   : > { %v2089_v60 = vsel %vm562_vm7, %v4416_v47, 0.0 }
 0x483   : > { %v2090_v15 = vadd.f32 %v2089_v60, %v2088_v27 }
 0x485   : > { %v2092_v9 = vadd.f32 %v2091_v36, %v2090_v15 }
 0x486   : > { %v4424_v11 = vpop.f32.mrb[16].mxu1 }
 0x487   : > { %v4426_v12 = vpop.f32.mrb[17].mxu1  ;;  %v2094_v49 = vadd.f32 %v2093_v23, %v2092_v9  ;;  %v2099_v28 = vsel %vm562_vm7, %v4424_v11, 0.0 }
 0x488   : > { %v2095_v45 = vsel %vm562_vm7, %v4426_v12, 0.0  ;;  %v4430_v48 = vpop.f32.mrb[18].mxu1 }
 0x489   : > { %v2096_v46 = vadd.f32 %v2095_v45, %v2094_v49  ;;  %v4432_v58 = vpop.f32.mrb[19].mxu1  ;;  %v2101_v31 = vsel %vm562_vm7, %v4430_v48, 0.0 }
 0x48a   : > { %v2097_v63 = vsel %vm562_vm7, %v4432_v58, 0.0 }
 0x48b   : > { %v2098_v33 = vadd.f32 %v2097_v63, %v2096_v46 }
 0x48d   : > { %v2100_v41 = vadd.f32 %v2099_v28, %v2098_v33 }
 0x48e   : > { %v4440_v29 = vpop.f32.mrb[20].mxu1 }
 0x48f   : > { %v4442_v13 = vpop.f32.mrb[21].mxu1  ;;  %v2102_v2 = vadd.f32 %v2101_v31, %v2100_v41  ;;  %v2107_v3 = vsel %vm562_vm7, %v4440_v29, 0.0 }
 0x490   : > { %v2103_v38 = vsel %vm562_vm7, %v4442_v13, 0.0  ;;  %v4446_v4 = vpop.f32.mrb[22].mxu1 }
 0x491   : > { %v2104_v62 = vadd.f32 %v2103_v38, %v2102_v2  ;;  %v2020_v24 = vpop.f32.mrb[23].mxu1  ;;  %v2109_v39 = vsel %vm562_vm7, %v4446_v4, 0.0 }
 0x492   : > { %v2105_v7 = vsel %vm562_vm7, %v2020_v24, 0.0 }
 0x493   : > { %v2106_v32 = vadd.f32 %v2105_v7, %v2104_v62 }
 0x495   : > { %v2108_v10 = vadd.f32 %v2107_v3, %v2106_v32 }
 0x496   : > { %v2580_v1 = vpop.f32.mrb[24].mxu1 }
 0x497   : > { %v2033_v22 = vpop.f32.mrb[25].mxu1  ;;  %v2110_v56 = vadd.f32 %v2109_v39, %v2108_v10  ;;  %v2115_v44 = vsel %vm562_vm7, %v2580_v1, 0.0 }
 0x498   : > { %v2111_v50 = vsel %vm562_vm7, %v2033_v22, 0.0  ;;  %v2581_v35 = vpop.f32.mrb[26].mxu1 }
 0x499   : > { %v2112_v6 = vadd.f32 %v2111_v50, %v2110_v56  ;;  %v2036_v34 = vpop.f32.mrb[27].mxu1  ;;  %v2117_v59 = vsel %vm562_vm7, %v2581_v35, 0.0 }
 0x49a   : > { %v2113_v25 = vsel %vm562_vm7, %v2036_v34, 0.0 }
 0x49b   : > { %v2114_v14 = vadd.f32 %v2113_v25, %v2112_v6 }
 0x49d   : > { %v2116_v20 = vadd.f32 %v2115_v44, %v2114_v14 }
 0x49e   : > { %v2584_v18 = vpop.f32.mrb[28].mxu1 }
 0x49f   : > { %v2049_v55 = vpop.f32.mrb[29].mxu1  ;;  %v2118_v53 = vadd.f32 %v2117_v59, %v2116_v20  ;;  %v2123_v36 = vsel %vm562_vm7, %v2584_v18, 0.0 }
 0x4a0   : > { %v2119_v21 = vsel %vm562_vm7, %v2049_v55, 0.0  ;;  %v2585_v43 = vpop.f32.mrb[30].mxu1 }
 0x4a1   : > { %v2120_v19 = vadd.f32 %v2119_v21, %v2118_v53  ;;  %v2052_v27 = vpop.f32.mrb[31].mxu1  ;;  %v2125_v23 = vsel %vm562_vm7, %v2585_v43, 0.0 }
 0x4a2   : > { %v2121_v60 = vsel %vm562_vm7, %v2052_v27, 0.0 }
 0x4a3   : > { %v2122_v15 = vadd.f32 %v2121_v60, %v2120_v19 }
 0x4a5   : > { %v2124_v9 = vadd.f32 %v2123_v36, %v2122_v15 }
 0x4a7   : > { %v2126_v49 = vadd.f32 %v2125_v23, %v2124_v9 }
 0x4a9   : > { %v2127_v45 = vrot.slane %v2126_v49, 4 }
 0x4ab   : > { %v2128_v46 = vadd.f32 %v2127_v45, %v2126_v49 }
 0x4ad   : > { %v2129_v63 = vrot.slane %v2128_v46, 2 }
 0x4af   : > { %v2130_v33 = vadd.f32 %v2129_v63, %v2128_v46 }
 0x4b1   : > { %v2131_v28 = vrot.slane %v2130_v33, 1 }
 0x4b3   : > { %v2132_v41 = vadd.f32 %v2131_v28, %v2130_v33 }
 0x4b5   : > { %v2133_v31 = vmul.f32 0.00390625, %v2132_v41 }
 0x4b7   : > { %v4462_v2 = vsub.f32 %v4362_v0, %v2133_v31  ;;  %v4465_v38 = vsub.f32 %v4366_v52, %v2133_v31  ;;  %v4468_v62 = vsub.f32 %v4360_v42, %v2133_v31  ;;  %v4471_v7 = vsub.f32 %v4364_v16, %v2133_v31 }
 0x4b8   : > { %v4474_v32 = vsub.f32 %v4378_v8, %v2133_v31  ;;  %v4477_v3 = vsub.f32 %v4384_v51, %v2133_v31  ;;  %v4480_v10 = vsub.f32 %v4376_v17, %v2133_v31  ;;  %v4483_v0 = vsub.f32 %v4382_v57, %v2133_v31 }
 0x4b9   : > { %v4486_v52 = vsub.f32 %v4394_v26, %v2133_v31  ;;  %v4489_v42 = vsub.f32 %v4400_v37, %v2133_v31  ;;  %v4492_v16 = vsub.f32 %v4392_v40, %v2133_v31  ;;  %v4495_v8 = vsub.f32 %v4398_v5, %v2133_v31 }
 0x4ba   : > { %v4498_v51 = vsub.f32 %v4410_v30, %v2133_v31  ;;  %v4501_v17 = vsub.f32 %v4416_v47, %v2133_v31  ;;  %v4504_v57 = vsub.f32 %v4408_v61, %v2133_v31  ;;  %v4507_v26 = vsub.f32 %v4414_v54, %v2133_v31 }
 0x4bb   : > { %v4510_v37 = vsub.f32 %v4426_v12, %v2133_v31  ;;  %v4513_v40 = vsub.f32 %v4432_v58, %v2133_v31  ;;  %v4516_v5 = vsub.f32 %v4424_v11, %v2133_v31  ;;  %v4519_v30 = vsub.f32 %v4430_v48, %v2133_v31 }
 0x4bc   : > { %v4522_v47 = vsub.f32 %v4442_v13, %v2133_v31  ;;  %v4524_v61 = vsub.f32 %v2020_v24, %v2133_v31  ;;  %v4527_v54 = vsub.f32 %v4440_v29, %v2133_v31  ;;  %v4530_v12 = vsub.f32 %v4446_v4, %v2133_v31 }
 0x4bd   : > { %v4532_v39 = vsub.f32 %v2033_v22, %v2133_v31  ;;  %v4534_v58 = vsub.f32 %v2036_v34, %v2133_v31  ;;  %v4536_v11 = vsub.f32 %v2580_v1, %v2133_v31  ;;  %v4538_v56 = vsub.f32 %v2581_v35, %v2133_v31 }
 0x4be   : > { %v4540_v48 = vsub.f32 %v2049_v55, %v2133_v31  ;;  %v4542_v13 = vsub.f32 %v2052_v27, %v2133_v31  ;;  %v4544_v24 = vsub.f32 %v2584_v18, %v2133_v31  ;;  %v4546_v50 = vsub.f32 %v2585_v43, %v2133_v31 }
 0x4bf   : > { %v2166_v29 = vmul.f32 %v4462_v2, %v4462_v2  ;;  %v2167_v4 = vmul.f32 %v4465_v38, %v4465_v38  ;;  %v2168_v1 = vmul.f32 %v4468_v62, %v4468_v62  ;;  %v2169_v22 = vmul.f32 %v4471_v7, %v4471_v7 }
 0x4c0   : > { %v2170_v25 = vmul.f32 %v4474_v32, %v4474_v32  ;;  %v2171_v20 = vmul.f32 %v4477_v3, %v4477_v3  ;;  %v2172_v55 = vmul.f32 %v4480_v10, %v4480_v10  ;;  %v2173_v43 = vmul.f32 %v4483_v0, %v4483_v0 }
 0x4c1   : > { %v2198_v35 = vsel %vm562_vm7, %v2166_v29, 0.0  ;;  %v2199_v6 = vsel %vm562_vm7, %v2167_v4, 0.0  ;;  %v2201_v14 = vsel %vm562_vm7, %v2168_v1, 0.0  ;;  %v2203_v59 = vsel %vm562_vm7, %v2169_v22, 0.0 }
 0x4c2   : > { %v2200_v34 = vadd.f32 %v2199_v6, %v2198_v35  ;;  %v2205_v53 = vsel %vm562_vm7, %v2170_v25, 0.0  ;;  %v2207_v19 = vsel %vm562_vm7, %v2171_v20, 0.0  ;;  %v2174_v60 = vmul.f32 %v4486_v52, %v4486_v52 }
 0x4c3   : > { %v2209_v15 = vsel %vm562_vm7, %v2172_v55, 0.0  ;;  %v2175_v9 = vmul.f32 %v4489_v42, %v4489_v42  ;;  %v2211_v23 = vsel %vm562_vm7, %v2173_v43, 0.0  ;;  %v2176_v45 = vmul.f32 %v4492_v16, %v4492_v16 }
 0x4c4   : > { %v2202_v44 = vadd.f32 %v2201_v14, %v2200_v34  ;;  %v2213_v46 = vsel %vm562_vm7, %v2174_v60, 0.0  ;;  %v2177_v33 = vmul.f32 %v4495_v8, %v4495_v8  ;;  %v2178_v31 = vmul.f32 %v4498_v51, %v4498_v51 }
 0x4c5   : > { %v2215_v28 = vsel %vm562_vm7, %v2175_v9, 0.0  ;;  %v2217_v29 = vsel %vm562_vm7, %v2176_v45, 0.0  ;;  %v2179_v1 = vmul.f32 %v4501_v17, %v4501_v17  ;;  %v2180_v6 = vmul.f32 %v4504_v57, %v4504_v57 }
 0x4c6   : > { %v2204_v18 = vadd.f32 %v2203_v59, %v2202_v44  ;;  %v2219_v22 = vsel %vm562_vm7, %v2177_v33, 0.0  ;;  %v2221_v34 = vsel %vm562_vm7, %v2178_v31, 0.0  ;;  %v2181_v14 = vmul.f32 %v4507_v26, %v4507_v26 }
 0x4c7   : > { %v2223_v44 = vsel %vm562_vm7, %v2179_v1, 0.0  ;;  %v2182_v59 = vmul.f32 %v4510_v37, %v4510_v37 }
 0x4c8   : > { %v2206_v21 = vadd.f32 %v2205_v53, %v2204_v18  ;;  %v2225_v18 = vsel %vm562_vm7, %v2180_v6, 0.0  ;;  %v2183_v53 = vmul.f32 %v4513_v40, %v4513_v40 }
 0x4ca   : > { %v2208_v27 = vadd.f32 %v2207_v19, %v2206_v21  ;;  %v2227_v21 = vsel %vm562_vm7, %v2181_v14, 0.0  ;;  %v2184_v19 = vmul.f32 %v4516_v5, %v4516_v5 }
 0x4cc   : > { %v2210_v36 = vadd.f32 %v2209_v15, %v2208_v27  ;;  %v2229_v27 = vsel %vm562_vm7, %v2182_v59, 0.0  ;;  %v2185_v15 = vmul.f32 %v4519_v30, %v4519_v30 }
 0x4ce   : > { %v2212_v49 = vadd.f32 %v2211_v23, %v2210_v36  ;;  %v2231_v36 = vsel %vm562_vm7, %v2183_v53, 0.0  ;;  %v2186_v23 = vmul.f32 %v4522_v47, %v4522_v47 }
 0x4d0   : > { %v2214_v63 = vadd.f32 %v2213_v46, %v2212_v49  ;;  %v2233_v49 = vsel %vm562_vm7, %v2184_v19, 0.0  ;;  %v2187_v46 = vmul.f32 %v4524_v61, %v4524_v61 }
 0x4d2   : > { %v2216_v41 = vadd.f32 %v2215_v28, %v2214_v63  ;;  %v2235_v63 = vsel %vm562_vm7, %v2185_v15, 0.0  ;;  %v2188_v28 = vmul.f32 %v4527_v54, %v4527_v54 }
 0x4d4   : > { %v2218_v4 = vadd.f32 %v2217_v29, %v2216_v41  ;;  %v2237_v41 = vsel %vm562_vm7, %v2186_v23, 0.0  ;;  %v2189_v29 = vmul.f32 %v4530_v12, %v4530_v12 }
 0x4d6   : > { %v2220_v35 = vadd.f32 %v2219_v22, %v2218_v4  ;;  %v2239_v4 = vsel %vm562_vm7, %v2187_v46, 0.0  ;;  %v2190_v22 = vmul.f32 %v4532_v39, %v4532_v39 }
 0x4d8   : > { %v2222_v25 = vadd.f32 %v2221_v34, %v2220_v35  ;;  %v2241_v35 = vsel %vm562_vm7, %v2188_v28, 0.0  ;;  %v2191_v34 = vmul.f32 %v4534_v58, %v4534_v58 }
 0x4da   : > { %v2224_v20 = vadd.f32 %v2223_v44, %v2222_v25  ;;  %v2243_v25 = vsel %vm562_vm7, %v2189_v29, 0.0  ;;  %v2192_v44 = vmul.f32 %v4536_v11, %v4536_v11 }
 0x4dc   : > { %v2226_v55 = vadd.f32 %v2225_v18, %v2224_v20  ;;  %v2245_v20 = vsel %vm562_vm7, %v2190_v22, 0.0  ;;  %v2193_v18 = vmul.f32 %v4538_v56, %v4538_v56 }
 0x4de   : > { %v2228_v43 = vadd.f32 %v2227_v21, %v2226_v55  ;;  %v2247_v55 = vsel %vm562_vm7, %v2191_v34, 0.0  ;;  %v2194_v21 = vmul.f32 %v4540_v48, %v4540_v48 }
 0x4e0   : > { %v2230_v60 = vadd.f32 %v2229_v27, %v2228_v43  ;;  %v2249_v43 = vsel %vm562_vm7, %v2192_v44, 0.0  ;;  %v2195_v27 = vmul.f32 %v4542_v13, %v4542_v13 }
 0x4e2   : > { %v2232_v9 = vadd.f32 %v2231_v36, %v2230_v60  ;;  %v2251_v60 = vsel %vm562_vm7, %v2193_v18, 0.0  ;;  %v2196_v36 = vmul.f32 %v4544_v24, %v4544_v24 }
 0x4e4   : > { %v2234_v45 = vadd.f32 %v2233_v49, %v2232_v9  ;;  %v2253_v9 = vsel %vm562_vm7, %v2194_v21, 0.0  ;;  %v2197_v49 = vmul.f32 %v4546_v50, %v4546_v50 }
 0x4e6   : > { %v2236_v33 = vadd.f32 %v2235_v63, %v2234_v45  ;;  %v2255_v45 = vsel %vm562_vm7, %v2195_v27, 0.0  ;;  %v2257_v63 = vsel %vm562_vm7, %v2196_v36, 0.0  ;;  %v2259_v28 = vsel %vm562_vm7, %v2197_v49, 0.0  ;;  %v2614_v27 = vld [vmem:[%s2690_s17 + $0x20] sm:$0xff] }
 0x4e7   : > { %v2618_v49 = vld [vmem:[%s2690_s17 + $0x40] sm:$0xff] }
 0x4e8   : > { %v2238_v31 = vadd.f32 %v2237_v41, %v2236_v33 }
 0x4ea   : > { %v2240_v1 = vadd.f32 %v2239_v4, %v2238_v31 }
 0x4ec   : > { %v2242_v6 = vadd.f32 %v2241_v35, %v2240_v1 }
 0x4ee   : > { %v2244_v14 = vadd.f32 %v2243_v25, %v2242_v6 }
 0x4f0   : > { %v2246_v59 = vadd.f32 %v2245_v20, %v2244_v14 }
 0x4f2   : > { %v2248_v53 = vadd.f32 %v2247_v55, %v2246_v59 }
 0x4f4   : > { %v2250_v19 = vadd.f32 %v2249_v43, %v2248_v53 }
 0x4f6   : > { %v2252_v15 = vadd.f32 %v2251_v60, %v2250_v19  ;;  %v2615_v60 = vld [vmem:[%s2690_s17 + $0x28] sm:$0xff] }
 0x4f8   : > { %v2254_v23 = vadd.f32 %v2253_v9, %v2252_v15  ;;  %v2616_v15 = vld [vmem:[%s2690_s17 + $0x30] sm:$0xff]  ;;  %v2617_v9 = vld [vmem:[%s2690_s17 + $0x38] sm:$0xff] }
 0x4fa   : > { %v2256_v46 = vadd.f32 %v2255_v45, %v2254_v23 }
 0x4fc   : > { %v2258_v33 = vadd.f32 %v2257_v63, %v2256_v46  ;;  %v2619_v46 = vld [vmem:[%s2690_s17 + $0x48] sm:$0xff] }
 0x4fe   : > { %v2260_v41 = vadd.f32 %v2259_v28, %v2258_v33  ;;  %v2620_v33 = vld [vmem:[%s2690_s17 + $0x50] sm:$0xff] }
 0x500   : > { %v2261_v31 = vrot.slane %v2260_v41, 4 }
 0x502   : > { %v2262_v29 = vadd.f32 %v2261_v31, %v2260_v41  ;;  %v2621_v41 = vld [vmem:[%s2690_s17 + $0x58] sm:$0xff] }
 0x504   : > { %v2263_v4 = vrot.slane %v2262_v29, 2 }
 0x506   : > { %v2264_v1 = vadd.f32 %v2263_v4, %v2262_v29  ;;  %v2622_v29 = vld [vmem:[%s2690_s17 + $0x60] sm:$0xff] }
 0x508   : > { %v2265_v22 = vrot.slane %v2264_v1, 1 }
 0x50a   : > { %v2266_v35 = vadd.f32 %v2265_v22, %v2264_v1  ;;  %v2623_v1 = vld [vmem:[%s2690_s17 + $0x68] sm:$0xff] }
 0x50c   : > { %v2267_v6 = vmul.f32 0.00390625, %v2266_v35  ;;  %v2624_v35 = vld [vmem:[%s2690_s17 + $0x70] sm:$0xff] }
 0x50e   : > { %v2268_v34 = vadd.f32 1e-05, %v2267_v6 }
 0x510   : > { %2608 = vrsqrt.f32 %v2268_v34  ;;  %v2625_v34 = vld [vmem:[%s2690_s17 + $0x78] sm:$0xff] }
 0x51a   : > { %v2609_v25 = vpop.eup %2608 }
 0x51b   : > { %v2270_v14 = vmul.f32 %v2609_v25, %v4462_v2  ;;  %v2271_v44 = vmul.f32 %v2609_v25, %v4465_v38  ;;  %v2272_v20 = vmul.f32 %v2609_v25, %v4468_v62  ;;  %v2273_v59 = vmul.f32 %v2609_v25, %v4471_v7 }
 0x51c   : > { %v2274_v18 = vmul.f32 %v2609_v25, %v4474_v32  ;;  %v2275_v55 = vmul.f32 %v2609_v25, %v4477_v3  ;;  %v2276_v53 = vmul.f32 %v2609_v25, %v4480_v10  ;;  %v2277_v21 = vmul.f32 %v2609_v25, %v4483_v0 }
 0x51d   : > { %v2278_v43 = vmul.f32 %v2609_v25, %v4486_v52  ;;  %v2279_v19 = vmul.f32 %v2609_v25, %v4489_v42  ;;  %v2280_v2 = vmul.f32 %v2609_v25, %v4492_v16  ;;  %v2281_v38 = vmul.f32 %v2609_v25, %v4495_v8 }
 0x51e   : > { %v2282_v62 = vmul.f32 %v2609_v25, %v4498_v51  ;;  %v2283_v7 = vmul.f32 %v2609_v25, %v4501_v17  ;;  %v2284_v32 = vmul.f32 %v2609_v25, %v4504_v57  ;;  %v2285_v3 = vmul.f32 %v2609_v25, %v4507_v26 }
 0x51f   : > { %v2286_v10 = vmul.f32 %v2609_v25, %v4510_v37  ;;  %v2287_v0 = vmul.f32 %v2609_v25, %v4513_v40  ;;  %v2288_v52 = vmul.f32 %v2609_v25, %v4516_v5  ;;  %v2289_v42 = vmul.f32 %v2609_v25, %v4519_v30 }
 0x520   : > { %v4665_v16 = vmul.f32 %v2609_v25, %v4522_v47  ;;  %v4668_v8 = vmul.f32 %v2609_v25, %v4524_v61  ;;  %v4671_v51 = vmul.f32 %v2609_v25, %v4527_v54  ;;  %v4674_v17 = vmul.f32 %v2609_v25, %v4530_v12  ;;  %v2610_v54 = vld [vmem:[%s2690_s17] sm:$0xff] }
 0x521   : > { %v4677_v57 = vmul.f32 %v2609_v25, %v4532_v39  ;;  %v4680_v26 = vmul.f32 %v2609_v25, %v4534_v58  ;;  %v4683_v37 = vmul.f32 %v2609_v25, %v4536_v11  ;;  %v4686_v40 = vmul.f32 %v2609_v25, %v4538_v56  ;;  %v2611_v39 = vld [vmem:[%s2690_s17 + $0x8] sm:$0xff]  ;;  %v2612_v11 = vld [vmem:[%s2690_s17 + $0x10] sm:$0xff] }
 0x522   : > { %v4696_v5 = vmul.f32 %v2609_v25, %v4540_v48  ;;  %v4699_v30 = vmul.f32 %v2609_v25, %v4542_v13  ;;  %v4702_v47 = vmul.f32 %v2609_v25, %v4544_v24  ;;  %v4705_v61 = vmul.f32 %v2609_v25, %v4546_v50  ;;  %v2613_v48 = vld [vmem:[%s2690_s17 + $0x18] sm:$0xff] }
 0x523   : > { %v2302_v12 = vadd.f32 %v2610_v54, %v2270_v14  ;;  %v2303_v58 = vadd.f32 %v2611_v39, %v2271_v44  ;;  %v2304_v56 = vadd.f32 %v2612_v11, %v2272_v20  ;;  %v2305_v13 = vadd.f32 %v2613_v48, %v2273_v59  ;;  %v2626_v14 = vld [vmem:[%s2690_s17 + $0x80] sm:$0xff]  ;;  %v2627_v20 = vld [vmem:[%s2690_s17 + $0x88] sm:$0xff]  ;;  %v2640_v54 = vld [vmem:[%s2690_s17 + $0xf0] sm:$0xff] }
 0x524   : > { %v2306_v24 = vadd.f32 %v2614_v27, %v2274_v18  ;;  %v2307_v50 = vadd.f32 %v2615_v60, %v2275_v55  ;;  %v2308_v36 = vadd.f32 %v2616_v15, %v2276_v53  ;;  %v2309_v23 = vadd.f32 %v2617_v9, %v2277_v21  ;;  %v2628_v18 = vld [vmem:[%s2690_s17 + $0x90] sm:$0xff]  ;;  %v2629_v53 = vld [vmem:[%s2690_s17 + $0x98] sm:$0xff] }
 0x525   : > { %v2310_v45 = vadd.f32 %v2618_v49, %v2278_v43  ;;  %v2311_v63 = vadd.f32 %v2619_v46, %v2279_v19  ;;  %v2312_v28 = vadd.f32 %v2620_v33, %v2280_v2  ;;  %v2313_v31 = vadd.f32 %v2621_v41, %v2281_v38  ;;  %2334 = vst.msk [vmem:[%s4693_s9] sm:$0xff] %vm562_vm7, %v2302_v12  ;;  %v2630_v43 = vld [vmem:[%s2690_s17 + $0xa0] sm:$0xff]  ;;  %v2631_v2 = vld [vmem:[%s2690_s17 + $0xa8] sm:$0xff]  ;;  %v2641_v39 = vld [vmem:[%s2690_s17 + $0xf8] sm:$0xff] }
 0x526   : > { %2335 = vst.msk [vmem:[%s4693_s9 + $0x8] sm:$0xff] %vm562_vm7, %v2303_v58  ;;  %2336 = vst.msk [vmem:[%s4693_s9 + $0x10] sm:$0xff] %vm562_vm7, %v2304_v56  ;;  %v2314_v4 = vadd.f32 %v2622_v29, %v2282_v62  ;;  %v2315_v22 = vadd.f32 %v2623_v1, %v2283_v7  ;;  %v2316_v6 = vadd.f32 %v2624_v35, %v2284_v32  ;;  %v2632_v62 = vld [vmem:[%s2690_s17 + $0xb0] sm:$0xff]  ;;  %v2633_v32 = vld [vmem:[%s2690_s17 + $0xb8] sm:$0xff] }
 0x527   : > { %2337 = vst.msk [vmem:[%s4693_s9 + $0x18] sm:$0xff] %vm562_vm7, %v2305_v13  ;;  %v2317_v25 = vadd.f32 %v2625_v34, %v2285_v3  ;;  %2338 = vst.msk [vmem:[%s4693_s9 + $0x20] sm:$0xff] %vm562_vm7, %v2306_v24  ;;  %v2318_v44 = vadd.f32 %v2626_v14, %v2286_v10  ;;  %v2319_v59 = vadd.f32 %v2627_v20, %v2287_v0  ;;  %v2634_v10 = vld [vmem:[%s2690_s17 + $0xc0] sm:$0xff] }
 0x528   : > { %2339 = vst.msk [vmem:[%s4693_s9 + $0x28] sm:$0xff] %vm562_vm7, %v2307_v50  ;;  %2340 = vst.msk [vmem:[%s4693_s9 + $0x30] sm:$0xff] %vm562_vm7, %v2308_v36  ;;  %v2320_v55 = vadd.f32 %v2628_v18, %v2288_v52  ;;  %v2321_v21 = vadd.f32 %v2629_v53, %v2289_v42  ;;  %v2322_v19 = vadd.f32 %v2630_v43, %v4665_v16  ;;  %v2635_v52 = vld [vmem:[%s2690_s17 + $0xc8] sm:$0xff]  ;;  %v2636_v16 = vld [vmem:[%s2690_s17 + $0xd0] sm:$0xff] }
 0x529   : > { %2341 = vst.msk [vmem:[%s4693_s9 + $0x38] sm:$0xff] %vm562_vm7, %v2309_v23  ;;  %2342 = vst.msk [vmem:[%s4693_s9 + $0x40] sm:$0xff] %vm562_vm7, %v2310_v45  ;;  %v2323_v38 = vadd.f32 %v2631_v2, %v4668_v8  ;;  %v2324_v7 = vadd.f32 %v2632_v62, %v4671_v51  ;;  %v2325_v3 = vadd.f32 %v2633_v32, %v4674_v17  ;;  %v2637_v51 = vld [vmem:[%s2690_s17 + $0xd8] sm:$0xff] }
 0x52a   : > { %2343 = vst.msk [vmem:[%s4693_s9 + $0x48] sm:$0xff] %vm562_vm7, %v2311_v63  ;;  %2344 = vst.msk [vmem:[%s4693_s9 + $0x50] sm:$0xff] %vm562_vm7, %v2312_v28  ;;  %v2326_v0 = vadd.f32 %v2634_v10, %v4677_v57  ;;  %v2327_v42 = vadd.f32 %v2635_v52, %v4680_v26  ;;  %v2328_v8 = vadd.f32 %v2636_v16, %v4683_v37  ;;  %v2638_v57 = vld [vmem:[%s2690_s17 + $0xe0] sm:$0xff]  ;;  %v2639_v37 = vld [vmem:[%s2690_s17 + $0xe8] sm:$0xff] }
 0x52b   : > { %2345 = vst.msk [vmem:[%s4693_s9 + $0x58] sm:$0xff] %vm562_vm7, %v2313_v31  ;;  %2346 = vst.msk [vmem:[%s4693_s9 + $0x60] sm:$0xff] %vm562_vm7, %v2314_v4  ;;  %v2329_v17 = vadd.f32 %v2637_v51, %v4686_v40  ;;  %v2330_v26 = vadd.f32 %v2638_v57, %v4696_v5  ;;  %v2331_v40 = vadd.f32 %v2639_v37, %v4699_v30 }
 0x52c   : > { %2347 = vst.msk [vmem:[%s4693_s9 + $0x68] sm:$0xff] %vm562_vm7, %v2315_v22  ;;  %2348 = vst.msk [vmem:[%s4693_s9 + $0x70] sm:$0xff] %vm562_vm7, %v2316_v6  ;;  %v2332_v12 = vadd.f32 %v2640_v54, %v4702_v47  ;;  %v2333_v58 = vadd.f32 %v2641_v39, %v4705_v61 }
 0x52d   : > { %2349 = vst.msk [vmem:[%s4693_s9 + $0x78] sm:$0xff] %vm562_vm7, %v2317_v25  ;;  %2350 = vst.msk [vmem:[%s4693_s9 + $0x80] sm:$0xff] %vm562_vm7, %v2318_v44 }
 0x52e   : > { %2351 = vst.msk [vmem:[%s4693_s9 + $0x88] sm:$0xff] %vm562_vm7, %v2319_v59  ;;  %2352 = vst.msk [vmem:[%s4693_s9 + $0x90] sm:$0xff] %vm562_vm7, %v2320_v55 }
 0x52f   : > { %2353 = vst.msk [vmem:[%s4693_s9 + $0x98] sm:$0xff] %vm562_vm7, %v2321_v21  ;;  %2354 = vst.msk [vmem:[%s4693_s9 + $0xa0] sm:$0xff] %vm562_vm7, %v2322_v19 }
 0x530   : > { %2355 = vst.msk [vmem:[%s4693_s9 + $0xa8] sm:$0xff] %vm562_vm7, %v2323_v38  ;;  %2356 = vst.msk [vmem:[%s4693_s9 + $0xb0] sm:$0xff] %vm562_vm7, %v2324_v7 }
 0x531   : > { %2357 = vst.msk [vmem:[%s4693_s9 + $0xb8] sm:$0xff] %vm562_vm7, %v2325_v3  ;;  %2358 = vst.msk [vmem:[%s4693_s9 + $0xc0] sm:$0xff] %vm562_vm7, %v2326_v0 }
 0x532   : > { %2359 = vst.msk [vmem:[%s4693_s9 + $0xc8] sm:$0xff] %vm562_vm7, %v2327_v42  ;;  %2360 = vst.msk [vmem:[%s4693_s9 + $0xd0] sm:$0xff] %vm562_vm7, %v2328_v8 }
 0x533   : > { %2361 = vst.msk [vmem:[%s4693_s9 + $0xd8] sm:$0xff] %vm562_vm7, %v2329_v17  ;;  %2362 = vst.msk [vmem:[%s4693_s9 + $0xe0] sm:$0xff] %vm562_vm7, %v2330_v26 }
 0x534   : > { %2363 = vst.msk [vmem:[%s4693_s9 + $0xe8] sm:$0xff] %vm562_vm7, %v2331_v40  ;;  %2364 = vst.msk [vmem:[%s4693_s9 + $0xf0] sm:$0xff] %vm562_vm7, %v2332_v12 }
 0x535   : > { %2365 = vst.msk [vmem:[%s4693_s9 + $0xf8] sm:$0xff] %vm562_vm7, %v2333_v58 }
 0x536 PF: > { %s13_s12 = sadd.s32 1, %s2648_s12  }
 0x537   : > { %p10_p4 = scmp.ge.s32.totalorder %s13_s12, 4  }
 0x539   :  { %12 = sbr.rel (!%p10_p4) target bundleno = 1 (0x1), region = 62 }

</bundles_post_ra>
